<compile_context>
chip_gen: v7x
topology: tpu7x:2x2x1
jax: 0.10.0
libtpu: 0.0.40
codegen_flags: <defaults>
</compile_context>

<pallas_src>
import functools

import jax
import jax.numpy as jnp
import numpy as np
from jax import lax
from jax.experimental import pallas as pl
from jax.experimental.pallas import tpu as pltpu


def _roi_pool_kernel(idx_ref, hb_ref, hlo_ref, hhi_ref, ws_ref, we_ref,
                     x_ref, out_ref, *, W, C, P, MBH):
    """One ROI per grid step (ROIs pre-grouped by batch index).

    idx_ref : SMEM (R,)    int32  -- scalar-prefetch batch indices (drive x index_map)
    hb/hlo/hhi : SMEM (R*P,) int32 -- per-(roi, ph): clamped slice start, local valid
                                      row range [hlo, hhi) within the MBH-row slice
    ws/we   : SMEM (R*P,)  int32  -- per-(roi, pw) w window [wstart, wend)
    x_ref   : VMEM (1,H,W,C)      -- feature-map slice of this ROI's batch element
    out_ref : VMEM (1,P*P,C)      -- pooled bins, row-major (ph, pw)
    """
    r = pl.program_id(0)
    base = r * P

    h_iota = lax.broadcasted_iota(jnp.int32, (MBH, 1, 1), 0)   # (MBH,1,1)
    w_iota = lax.broadcasted_iota(jnp.int32, (W, 1), 0)        # (W,1)
    neg = jnp.array(-jnp.inf, dtype=x_ref.dtype)

    # w-windows depend only on pw -> hoist masks/flags out of the ph loop.
    wmasks, wempty = [], []
    for pw in range(P):
        ws = ws_ref[base + pw]
        we = we_ref[base + pw]
        wmasks.append((w_iota >= ws) & (w_iota < we))          # (W,1)
        wempty.append(we <= ws)

    for ph in range(P):                      # static unrolled loops (P is small)
        hb = hb_ref[base + ph]               # clamped slice start in [0, H-MBH]
        hlo = hlo_ref[base + ph]             # valid local rows are [hlo, hhi)
        hhi = hhi_ref[base + ph]
        # Bounded dynamic h-slice: only MBH rows are touched instead of all H.
        xh = x_ref[0, pl.ds(hb, MBH), :, :]                    # (MBH, W, C)
        hmask = (h_iota >= hlo) & (h_iota < hhi)
        strip = jnp.max(jnp.where(hmask, xh, neg), axis=0)     # (W, C)
        h_empty = hhi <= hlo
        for pw in range(P):
            bin_max = jnp.max(jnp.where(wmasks[pw], strip, neg),
                              axis=0, keepdims=True)           # (1, C)
            is_empty = h_empty | wempty[pw]
            row = ph * P + pw                                  # static index
            # Direct store of this bin (no rows+stack -> bounded vreg live range).
            out_ref[0, row:row + 1, :] = jnp.where(
                is_empty, jnp.zeros_like(bin_max), bin_max)


def _round_half_away(v):
    # torchvision RoIPool uses C round(): half away from zero.
    return jnp.sign(v) * jnp.floor(jnp.abs(v) + 0.5)


def _compute_windows(rois_xyxy, P, spatial_scale, H, W, max_bin_h):
    """Per-ROI integer bin windows + bounded-slice parameters (torchvision RoIPool)."""
    x1, y1, x2, y2 = (rois_xyxy[:, 0], rois_xyxy[:, 1],
                      rois_xyxy[:, 2], rois_xyxy[:, 3])
    rsw = _round_half_away(x1 * spatial_scale).astype(jnp.int32)
    rsh = _round_half_away(y1 * spatial_scale).astype(jnp.int32)
    rew = _round_half_away(x2 * spatial_scale).astype(jnp.int32)
    reh = _round_half_away(y2 * spatial_scale).astype(jnp.int32)

    roi_w = jnp.maximum(rew - rsw + 1, 1).astype(jnp.float32)
    roi_h = jnp.maximum(reh - rsh + 1, 1).astype(jnp.float32)
    bin_h = roi_h / float(P)   # (R,)
    bin_w = roi_w / float(P)

    p = jnp.arange(P, dtype=jnp.float32)
    hstart = jnp.clip(jnp.floor(p[None, :] * bin_h[:, None]).astype(jnp.int32)
                      + rsh[:, None], 0, H)
    hend = jnp.clip(jnp.ceil((p[None, :] + 1.0) * bin_h[:, None]).astype(jnp.int32)
                    + rsh[:, None], 0, H)
    wstart = jnp.clip(jnp.floor(p[None, :] * bin_w[:, None]).astype(jnp.int32)
                      + rsw[:, None], 0, W)
    wend = jnp.clip(jnp.ceil((p[None, :] + 1.0) * bin_w[:, None]).astype(jnp.int32)
                    + rsw[:, None], 0, W)

    # Bounded-slice parameters: kernel slices max_bin_h rows starting at hs_base and
    # keeps local rows [h_lo, h_hi).  Requires hend-hstart <= max_bin_h, which holds
    # whenever the ROI fits inside the image (standard for detection heads).
    hs_base = jnp.minimum(hstart, H - max_bin_h)   # hstart >= 0 and max_bin_h <= H
    h_lo = hstart - hs_base
    h_hi = hend - hs_base
    return hs_base, h_lo, h_hi, wstart, wend       # each (R, P) int32


def roi_forward(x_nchw, rois, roi_indices, *, roi_size, spatial_scale):
    """Pallas implementation of Roi.forward.

    x_nchw      : (N, C, H, W) float feature map
    rois        : (R, 4) float, (y1, x1, y2, x2) in image coordinates
    roi_indices : (R,)   batch index per ROI
    returns     : (R, C*roi_size*roi_size)
    """
    N, C, H, W = x_nchw.shape
    R = rois.shape[0]
    P = roi_size

    # layout: NCHW (PyTorch) -> NHWC for the TPU kernel (C on lanes, W on sublanes).
    # TODO(synk): have the producing conv emit NHWC directly to skip this extra HBM pass.
    x = jnp.transpose(x_nchw, (0, 2, 3, 1))
    if not jnp.issubdtype(x.dtype, jnp.floating):
        x = x.astype(jnp.float32)

    # Static bound on a bin's (clipped) height: ceil((H+1)/P)+1 covers any ROI that
    # fits within the image; clamp to H.
    MBH = min(H, (H + 1 + P - 1) // P + 1)

    # PyTorch glue: cat + column permutation [0,2,1,4,3] -> (idx, x1, y1, x2, y2).
    rois_f = rois.astype(jnp.float32)
    rois_xyxy = rois_f[:, jnp.array([1, 0, 3, 2])]  # (x1, y1, x2, y2)
    hs_base, h_lo, h_hi, wstart, wend = _compute_windows(
        rois_xyxy, P, float(spatial_scale), H, W, MBH)

    # Group ROIs by batch index so consecutive grid steps reuse the same feature-map
    # block (Pallas skips the re-DMA); undo the permutation afterwards.
    idx = roi_indices.astype(jnp.int32)
    order = jnp.argsort(idx)
    inv = jnp.argsort(order)
    idx_s = idx[order]
    hb_s = hs_base[order].reshape(-1)
    hlo_s = h_lo[order].reshape(-1)
    hhi_s = h_hi[order].reshape(-1)
    ws_s = wstart[order].reshape(-1)
    we_s = wend[order].reshape(-1)

    kernel = functools.partial(_roi_pool_kernel, W=W, C=C, P=P, MBH=MBH)
    smem_specs = [pl.BlockSpec(memory_space=pltpu.MemorySpace.SMEM)
                  for _ in range(5)]

    pool_s = pl.pallas_call(
        kernel,
        out_shape=jax.ShapeDtypeStruct((R, P * P, C), x.dtype),
        grid_spec=pltpu.PrefetchScalarGridSpec(
            num_scalar_prefetch=1,          # sorted batch indices drive x's index_map
            grid=(R,),
            in_specs=smem_specs + [
                # data-dependent batch slice of the feature map (block index repeats
                # while the sorted batch index stays constant -> DMA skipped)
                pl.BlockSpec((1, H, W, C), lambda r, idx_ref: (idx_ref[r], 0, 0, 0)),
            ],
            out_specs=pl.BlockSpec((1, P * P, C), lambda r, idx_ref: (r, 0, 0)),
        ),
        compiler_params=pltpu.CompilerParams(
            dimension_semantics=("parallel",),   # ROIs independent; shards on v7x's 2 TCs
            vmem_limit_bytes=48 * 1024 * 1024,   # headroom below v7x's 64 MiB physical VMEM
        ),
    )(idx_s, hb_s, hlo_s, hhi_s, ws_s, we_s, x)

    pool = pool_s[inv]                                   # undo batch-index grouping
    pool = pool.reshape(R, P, P, C)
    pool = jnp.transpose(pool, (0, 3, 1, 2)).reshape(R, -1)  # PyTorch (R, C*P*P)
    return pool


def _roi_pool_ref(x_nchw, roi_table_xyxy, roi_indices, P, spatial_scale):
    """Pure NumPy reference of torchvision RoIPool (round half away from zero) + flatten."""
    def rnd(v):
        return int(np.sign(v) * np.floor(abs(v) + 0.5))

    x = np.asarray(x_nchw, np.float32)
    _, C, H, W = x.shape
    R = roi_table_xyxy.shape[0]
    out = np.zeros((R, C, P, P), np.float32)
    for r in range(R):
        b = int(roi_indices[r])
        x1, y1, x2, y2 = [float(v) for v in roi_table_xyxy[r, 1:5]]
        rsw = rnd(x1 * spatial_scale)
        rsh = rnd(y1 * spatial_scale)
        rew = rnd(x2 * spatial_scale)
        reh = rnd(y2 * spatial_scale)
        rw = max(rew - rsw + 1, 1)
        rh = max(reh - rsh + 1, 1)
        bh = rh / P
        bw = rw / P
        for ph in range(P):
            hs = min(max(int(np.floor(ph * bh)) + rsh, 0), H)
            he = min(max(int(np.ceil((ph + 1) * bh)) + rsh, 0), H)
            for pw in range(P):
                ws = min(max(int(np.floor(pw * bw)) + rsw, 0), W)
                we = min(max(int(np.ceil((pw + 1) * bw)) + rsw, 0), W)
                if he <= hs or we <= ws:
                    out[r, :, ph, pw] = 0.0
                else:
                    out[r, :, ph, pw] = x[b, :, hs:he, ws:we].max(axis=(1, 2))
    return out.reshape(R, -1)


if __name__ == "__main__":
    key = jax.random.PRNGKey(0)
    N, C, H, W = 2, 4, 16, 16          # feature map (NCHW, as PyTorch would pass)
    R = 8                              # number of ROIs
    roi_size = 4                       # RoIPool output_size (P x P)
    spatial_scale = 1.0 / 4.0          # feature map = 1/4 of a 64x64 "image"
    img_size = 64.0

    k1, k2, k3 = jax.random.split(key, 3)
    x = jax.random.normal(k1, (N, C, H, W), dtype=jnp.float32)
    # rois in (y1, x1, y2, x2) image coordinates, as expected by Roi.forward
    yy = jnp.sort(jax.random.uniform(k2, (R, 2), minval=0.0, maxval=img_size - 1.0), axis=1)
    xx = jnp.sort(jax.random.uniform(k3, (R, 2), minval=0.0, maxval=img_size - 1.0), axis=1)
    rois = jnp.stack([yy[:, 0], xx[:, 0], yy[:, 1], xx[:, 1]], axis=1)
    roi_indices = jnp.array([0, 1, 0, 1, 0, 1, 0, 1], dtype=jnp.int32)  # interleaved on purpose

    pool = roi_forward(x, rois, roi_indices, roi_size=roi_size, spatial_scale=spatial_scale)
    pool = jax.block_until_ready(pool)

    # correctness check against a NumPy reference of the PyTorch semantics
    roi_table = np.concatenate(
        [np.asarray(roi_indices, np.float32)[:, None], np.asarray(rois, np.float32)], axis=1
    )[:, [0, 2, 1, 4, 3]]
    ref = _roi_pool_ref(x, roi_table, np.asarray(roi_indices), roi_size, spatial_scale)
    np.testing.assert_allclose(np.asarray(pool), ref, rtol=1e-6, atol=1e-6)

    assert pool.shape == (R, C * roi_size * roi_size)
    print("KERNEL_OK")
</pallas_src>

<mosaic_0001>
module attributes {stable_mosaic.version = 11 : i64} {
  func.func @_roi_pool_kernel(%arg0: i32, %arg1: memref<8xi32, #tpu.memory_space<smem>>, %arg2: memref<32xi32, #tpu.memory_space<smem>>, %arg3: memref<32xi32, #tpu.memory_space<smem>>, %arg4: memref<32xi32, #tpu.memory_space<smem>>, %arg5: memref<32xi32, #tpu.memory_space<smem>>, %arg6: memref<32xi32, #tpu.memory_space<smem>>, %arg7: memref<1x16x16x4xf32, #tpu.memory_space<vmem>>, %arg8: memref<1x16x4xf32, #tpu.memory_space<vmem>>) attributes {dimension_semantics = [#tpu.dimension_semantics<parallel>], iteration_bounds = array<i64: 8>, scalar_prefetch = 1 : i64, scratch_operands = 0 : i64, tpu.core_type = #tpu.core_type<tc>, window_params = [{transform_indices = @transform_0, window_bounds = array<i64: 32>}, {transform_indices = @transform_1, window_bounds = array<i64: 32>}, {transform_indices = @transform_2, window_bounds = array<i64: 32>}, {transform_indices = @transform_3, window_bounds = array<i64: 32>}, {transform_indices = @transform_4, window_bounds = array<i64: 32>}, {transform_indices = @transform_5, window_bounds = array<i64: 1, 16, 16, 4>}, {transform_indices = @transform_6, window_bounds = array<i64: 1, 16, 4>}]} {
    %c4_i32 = arith.constant 4 : i32
    %0 = arith.muli %arg0, %c4_i32 : i32
    %1 = tpu.iota {dimensions = array<i32: 0>} : vector<6x1x1xi32>
    %2 = tpu.iota {dimensions = array<i32: 0>} : vector<16x1xi32>
    %c0_i32 = arith.constant 0 : i32
    %3 = arith.addi %0, %c0_i32 : i32
    %4 = arith.index_cast %3 : i32 to index
    %5 = memref.load %arg5[%4] : memref<32xi32, #tpu.memory_space<smem>>
    %c0_i32_0 = arith.constant 0 : i32
    %6 = arith.addi %0, %c0_i32_0 : i32
    %7 = arith.index_cast %6 : i32 to index
    %8 = memref.load %arg6[%7] : memref<32xi32, #tpu.memory_space<smem>>
    %9 = vector.broadcast %5 : i32 to vector<16x1xi32>
    %10 = arith.cmpi sge, %2, %9 : vector<16x1xi32>
    %11 = vector.broadcast %8 : i32 to vector<16x1xi32>
    %12 = arith.cmpi slt, %2, %11 : vector<16x1xi32>
    %13 = arith.andi %10, %12 : vector<16x1xi1>
    %14 = arith.cmpi sle, %8, %5 : i32
    %c1_i32 = arith.constant 1 : i32
    %15 = arith.addi %0, %c1_i32 : i32
    %16 = arith.index_cast %15 : i32 to index
    %17 = memref.load %arg5[%16] : memref<32xi32, #tpu.memory_space<smem>>
    %c1_i32_1 = arith.constant 1 : i32
    %18 = arith.addi %0, %c1_i32_1 : i32
    %19 = arith.index_cast %18 : i32 to index
    %20 = memref.load %arg6[%19] : memref<32xi32, #tpu.memory_space<smem>>
    %21 = vector.broadcast %17 : i32 to vector<16x1xi32>
    %22 = arith.cmpi sge, %2, %21 : vector<16x1xi32>
    %23 = vector.broadcast %20 : i32 to vector<16x1xi32>
    %24 = arith.cmpi slt, %2, %23 : vector<16x1xi32>
    %25 = arith.andi %22, %24 : vector<16x1xi1>
    %26 = arith.cmpi sle, %20, %17 : i32
    %c2_i32 = arith.constant 2 : i32
    %27 = arith.addi %0, %c2_i32 : i32
    %28 = arith.index_cast %27 : i32 to index
    %29 = memref.load %arg5[%28] : memref<32xi32, #tpu.memory_space<smem>>
    %c2_i32_2 = arith.constant 2 : i32
    %30 = arith.addi %0, %c2_i32_2 : i32
    %31 = arith.index_cast %30 : i32 to index
    %32 = memref.load %arg6[%31] : memref<32xi32, #tpu.memory_space<smem>>
    %33 = vector.broadcast %29 : i32 to vector<16x1xi32>
    %34 = arith.cmpi sge, %2, %33 : vector<16x1xi32>
    %35 = vector.broadcast %32 : i32 to vector<16x1xi32>
    %36 = arith.cmpi slt, %2, %35 : vector<16x1xi32>
    %37 = arith.andi %34, %36 : vector<16x1xi1>
    %38 = arith.cmpi sle, %32, %29 : i32
    %c3_i32 = arith.constant 3 : i32
    %39 = arith.addi %0, %c3_i32 : i32
    %40 = arith.index_cast %39 : i32 to index
    %41 = memref.load %arg5[%40] : memref<32xi32, #tpu.memory_space<smem>>
    %c3_i32_3 = arith.constant 3 : i32
    %42 = arith.addi %0, %c3_i32_3 : i32
    %43 = arith.index_cast %42 : i32 to index
    %44 = memref.load %arg6[%43] : memref<32xi32, #tpu.memory_space<smem>>
    %45 = vector.broadcast %41 : i32 to vector<16x1xi32>
    %46 = arith.cmpi sge, %2, %45 : vector<16x1xi32>
    %47 = vector.broadcast %44 : i32 to vector<16x1xi32>
    %48 = arith.cmpi slt, %2, %47 : vector<16x1xi32>
    %49 = arith.andi %46, %48 : vector<16x1xi1>
    %50 = arith.cmpi sle, %44, %41 : i32
    %c0_i32_4 = arith.constant 0 : i32
    %51 = arith.addi %0, %c0_i32_4 : i32
    %52 = arith.index_cast %51 : i32 to index
    %53 = memref.load %arg2[%52] : memref<32xi32, #tpu.memory_space<smem>>
    %c0_i32_5 = arith.constant 0 : i32
    %54 = arith.addi %0, %c0_i32_5 : i32
    %55 = arith.index_cast %54 : i32 to index
    %56 = memref.load %arg3[%55] : memref<32xi32, #tpu.memory_space<smem>>
    %c0_i32_6 = arith.constant 0 : i32
    %57 = arith.addi %0, %c0_i32_6 : i32
    %58 = arith.index_cast %57 : i32 to index
    %59 = memref.load %arg4[%58] : memref<32xi32, #tpu.memory_space<smem>>
    %c0 = arith.constant 0 : index
    %60 = arith.index_cast %53 : i32 to index
    %c0_7 = arith.constant 0 : index
    %c0_8 = arith.constant 0 : index
    %61 = vector.load %arg7[%c0, %60, %c0_7, %c0_8] : memref<1x16x16x4xf32, #tpu.memory_space<vmem>>, vector<1x6x16x4xf32>
    %62 = vector.shape_cast %61 : vector<1x6x16x4xf32> to vector<6x16x4xf32>
    %63 = vector.broadcast %56 : i32 to vector<6x1x1xi32>
    %64 = arith.cmpi sge, %1, %63 : vector<6x1x1xi32>
    %65 = vector.broadcast %59 : i32 to vector<6x1x1xi32>
    %66 = arith.cmpi slt, %1, %65 : vector<6x1x1xi32>
    %67 = arith.andi %64, %66 : vector<6x1x1xi1>
    %cst = arith.constant 0xFF800000 : f32
    %68 = vector.shape_cast %67 : vector<6x1x1xi1> to vector<6x1x1xi1>
    %69 = vector.broadcast %68 : vector<6x1x1xi1> to vector<6x16x4xi1>
    %70 = vector.broadcast %cst : f32 to vector<6x16x4xf32>
    %71 = arith.select %69, %62, %70 : vector<6x16x4xi1>, vector<6x16x4xf32>
    %cst_9 = arith.constant dense<0xFF800000> : vector<16x4xf32>
    %72 = vector.multi_reduction <maximumf>, %71, %cst_9 [0] : vector<6x16x4xf32> to vector<16x4xf32>
    %73 = arith.cmpi sle, %59, %56 : i32
    %cst_10 = arith.constant 0xFF800000 : f32
    %74 = vector.shape_cast %13 : vector<16x1xi1> to vector<16x1xi1>
    %75 = vector.broadcast %74 : vector<16x1xi1> to vector<16x4xi1>
    %76 = vector.broadcast %cst_10 : f32 to vector<16x4xf32>
    %77 = arith.select %75, %72, %76 : vector<16x4xi1>, vector<16x4xf32>
    %cst_11 = arith.constant dense<0xFF800000> : vector<4xf32>
    %78 = vector.multi_reduction <maximumf>, %77, %cst_11 [0] : vector<16x4xf32> to vector<4xf32>
    %79 = vector.shape_cast %78 : vector<4xf32> to vector<1x4xf32>
    %80 = arith.ori %73, %14 : i1
    %cst_12 = arith.constant 0.000000e+00 : f32
    %81 = vector.broadcast %cst_12 : f32 to vector<1x4xf32>
    %82 = arith.select %80, %81, %79 : vector<1x4xf32>
    %c0_13 = arith.constant 0 : index
    %c0_14 = arith.constant 0 : index
    %c0_15 = arith.constant 0 : index
    %83 = vector.load %arg8[%c0_13, %c0_14, %c0_15] : memref<1x16x4xf32, #tpu.memory_space<vmem>>, vector<1x1x4xf32>
    %84 = vector.shape_cast %83 : vector<1x1x4xf32> to vector<1x4xf32>
    %85 = vector.shape_cast %82 : vector<1x4xf32> to vector<1x1x4xf32>
    tpu.vector_store %arg8[%c0_13, %c0_14, %c0_15], %85 {strides = array<i32>} : memref<1x16x4xf32, #tpu.memory_space<vmem>>, vector<1x1x4xf32>,
    %cst_16 = arith.constant 0xFF800000 : f32
    %86 = vector.shape_cast %25 : vector<16x1xi1> to vector<16x1xi1>
    %87 = vector.broadcast %86 : vector<16x1xi1> to vector<16x4xi1>
    %88 = vector.broadcast %cst_16 : f32 to vector<16x4xf32>
    %89 = arith.select %87, %72, %88 : vector<16x4xi1>, vector<16x4xf32>
    %cst_17 = arith.constant dense<0xFF800000> : vector<4xf32>
    %90 = vector.multi_reduction <maximumf>, %89, %cst_17 [0] : vector<16x4xf32> to vector<4xf32>
    %91 = vector.shape_cast %90 : vector<4xf32> to vector<1x4xf32>
    %92 = arith.ori %73, %26 : i1
    %cst_18 = arith.constant 0.000000e+00 : f32
    %93 = vector.broadcast %cst_18 : f32 to vector<1x4xf32>
    %94 = arith.select %92, %93, %91 : vector<1x4xf32>
    %c0_19 = arith.constant 0 : index
    %c1 = arith.constant 1 : index
    %c0_20 = arith.constant 0 : index
    %95 = vector.load %arg8[%c0_19, %c1, %c0_20] : memref<1x16x4xf32, #tpu.memory_space<vmem>>, vector<1x1x4xf32>
    %96 = vector.shape_cast %95 : vector<1x1x4xf32> to vector<1x4xf32>
    %97 = vector.shape_cast %94 : vector<1x4xf32> to vector<1x1x4xf32>
    tpu.vector_store %arg8[%c0_19, %c1, %c0_20], %97 {strides = array<i32>} : memref<1x16x4xf32, #tpu.memory_space<vmem>>, vector<1x1x4xf32>,
    %cst_21 = arith.constant 0xFF800000 : f32
    %98 = vector.shape_cast %37 : vector<16x1xi1> to vector<16x1xi1>
    %99 = vector.broadcast %98 : vector<16x1xi1> to vector<16x4xi1>
    %100 = vector.broadcast %cst_21 : f32 to vector<16x4xf32>
    %101 = arith.select %99, %72, %100 : vector<16x4xi1>, vector<16x4xf32>
    %cst_22 = arith.constant dense<0xFF800000> : vector<4xf32>
    %102 = vector.multi_reduction <maximumf>, %101, %cst_22 [0] : vector<16x4xf32> to vector<4xf32>
    %103 = vector.shape_cast %102 : vector<4xf32> to vector<1x4xf32>
    %104 = arith.ori %73, %38 : i1
    %cst_23 = arith.constant 0.000000e+00 : f32
    %105 = vector.broadcast %cst_23 : f32 to vector<1x4xf32>
    %106 = arith.select %104, %105, %103 : vector<1x4xf32>
    %c0_24 = arith.constant 0 : index
    %c2 = arith.constant 2 : index
    %c0_25 = arith.constant 0 : index
    %107 = vector.load %arg8[%c0_24, %c2, %c0_25] : memref<1x16x4xf32, #tpu.memory_space<vmem>>, vector<1x1x4xf32>
    %108 = vector.shape_cast %107 : vector<1x1x4xf32> to vector<1x4xf32>
    %109 = vector.shape_cast %106 : vector<1x4xf32> to vector<1x1x4xf32>
    tpu.vector_store %arg8[%c0_24, %c2, %c0_25], %109 {strides = array<i32>} : memref<1x16x4xf32, #tpu.memory_space<vmem>>, vector<1x1x4xf32>,
    %cst_26 = arith.constant 0xFF800000 : f32
    %110 = vector.shape_cast %49 : vector<16x1xi1> to vector<16x1xi1>
    %111 = vector.broadcast %110 : vector<16x1xi1> to vector<16x4xi1>
    %112 = vector.broadcast %cst_26 : f32 to vector<16x4xf32>
    %113 = arith.select %111, %72, %112 : vector<16x4xi1>, vector<16x4xf32>
    %cst_27 = arith.constant dense<0xFF800000> : vector<4xf32>
    %114 = vector.multi_reduction <maximumf>, %113, %cst_27 [0] : vector<16x4xf32> to vector<4xf32>
    %115 = vector.shape_cast %114 : vector<4xf32> to vector<1x4xf32>
    %116 = arith.ori %73, %50 : i1
    %cst_28 = arith.constant 0.000000e+00 : f32
    %117 = vector.broadcast %cst_28 : f32 to vector<1x4xf32>
    %118 = arith.select %116, %117, %115 : vector<1x4xf32>
    %c0_29 = arith.constant 0 : index
    %c3 = arith.constant 3 : index
    %c0_30 = arith.constant 0 : index
    %119 = vector.load %arg8[%c0_29, %c3, %c0_30] : memref<1x16x4xf32, #tpu.memory_space<vmem>>, vector<1x1x4xf32>
    %120 = vector.shape_cast %119 : vector<1x1x4xf32> to vector<1x4xf32>
    %121 = vector.shape_cast %118 : vector<1x4xf32> to vector<1x1x4xf32>
    tpu.vector_store %arg8[%c0_29, %c3, %c0_30], %121 {strides = array<i32>} : memref<1x16x4xf32, #tpu.memory_space<vmem>>, vector<1x1x4xf32>,
    %c1_i32_31 = arith.constant 1 : i32
    %122 = arith.addi %0, %c1_i32_31 : i32
    %123 = arith.index_cast %122 : i32 to index
    %124 = memref.load %arg2[%123] : memref<32xi32, #tpu.memory_space<smem>>
    %c1_i32_32 = arith.constant 1 : i32
    %125 = arith.addi %0, %c1_i32_32 : i32
    %126 = arith.index_cast %125 : i32 to index
    %127 = memref.load %arg3[%126] : memref<32xi32, #tpu.memory_space<smem>>
    %c1_i32_33 = arith.constant 1 : i32
    %128 = arith.addi %0, %c1_i32_33 : i32
    %129 = arith.index_cast %128 : i32 to index
    %130 = memref.load %arg4[%129] : memref<32xi32, #tpu.memory_space<smem>>
    %c0_34 = arith.constant 0 : index
    %131 = arith.index_cast %124 : i32 to index
    %c0_35 = arith.constant 0 : index
    %c0_36 = arith.constant 0 : index
    %132 = vector.load %arg7[%c0_34, %131, %c0_35, %c0_36] : memref<1x16x16x4xf32, #tpu.memory_space<vmem>>, vector<1x6x16x4xf32>
    %133 = vector.shape_cast %132 : vector<1x6x16x4xf32> to vector<6x16x4xf32>
    %134 = vector.broadcast %127 : i32 to vector<6x1x1xi32>
    %135 = arith.cmpi sge, %1, %134 : vector<6x1x1xi32>
    %136 = vector.broadcast %130 : i32 to vector<6x1x1xi32>
    %137 = arith.cmpi slt, %1, %136 : vector<6x1x1xi32>
    %138 = arith.andi %135, %137 : vector<6x1x1xi1>
    %cst_37 = arith.constant 0xFF800000 : f32
    %139 = vector.shape_cast %138 : vector<6x1x1xi1> to vector<6x1x1xi1>
    %140 = vector.broadcast %139 : vector<6x1x1xi1> to vector<6x16x4xi1>
    %141 = vector.broadcast %cst_37 : f32 to vector<6x16x4xf32>
    %142 = arith.select %140, %133, %141 : vector<6x16x4xi1>, vector<6x16x4xf32>
    %cst_38 = arith.constant dense<0xFF800000> : vector<16x4xf32>
    %143 = vector.multi_reduction <maximumf>, %142, %cst_38 [0] : vector<6x16x4xf32> to vector<16x4xf32>
    %144 = arith.cmpi sle, %130, %127 : i32
    %cst_39 = arith.constant 0xFF800000 : f32
    %145 = vector.shape_cast %13 : vector<16x1xi1> to vector<16x1xi1>
    %146 = vector.broadcast %145 : vector<16x1xi1> to vector<16x4xi1>
    %147 = vector.broadcast %cst_39 : f32 to vector<16x4xf32>
    %148 = arith.select %146, %143, %147 : vector<16x4xi1>, vector<16x4xf32>
    %cst_40 = arith.constant dense<0xFF800000> : vector<4xf32>
    %149 = vector.multi_reduction <maximumf>, %148, %cst_40 [0] : vector<16x4xf32> to vector<4xf32>
    %150 = vector.shape_cast %149 : vector<4xf32> to vector<1x4xf32>
    %151 = arith.ori %144, %14 : i1
    %cst_41 = arith.constant 0.000000e+00 : f32
    %152 = vector.broadcast %cst_41 : f32 to vector<1x4xf32>
    %153 = arith.select %151, %152, %150 : vector<1x4xf32>
    %c0_42 = arith.constant 0 : index
    %c4 = arith.constant 4 : index
    %c0_43 = arith.constant 0 : index
    %154 = vector.load %arg8[%c0_42, %c4, %c0_43] : memref<1x16x4xf32, #tpu.memory_space<vmem>>, vector<1x1x4xf32>
    %155 = vector.shape_cast %154 : vector<1x1x4xf32> to vector<1x4xf32>
    %156 = vector.shape_cast %153 : vector<1x4xf32> to vector<1x1x4xf32>
    tpu.vector_store %arg8[%c0_42, %c4, %c0_43], %156 {strides = array<i32>} : memref<1x16x4xf32, #tpu.memory_space<vmem>>, vector<1x1x4xf32>,
    %cst_44 = arith.constant 0xFF800000 : f32
    %157 = vector.shape_cast %25 : vector<16x1xi1> to vector<16x1xi1>
    %158 = vector.broadcast %157 : vector<16x1xi1> to vector<16x4xi1>
    %159 = vector.broadcast %cst_44 : f32 to vector<16x4xf32>
    %160 = arith.select %158, %143, %159 : vector<16x4xi1>, vector<16x4xf32>
    %cst_45 = arith.constant dense<0xFF800000> : vector<4xf32>
    %161 = vector.multi_reduction <maximumf>, %160, %cst_45 [0] : vector<16x4xf32> to vector<4xf32>
    %162 = vector.shape_cast %161 : vector<4xf32> to vector<1x4xf32>
    %163 = arith.ori %144, %26 : i1
    %cst_46 = arith.constant 0.000000e+00 : f32
    %164 = vector.broadcast %cst_46 : f32 to vector<1x4xf32>
    %165 = arith.select %163, %164, %162 : vector<1x4xf32>
    %c0_47 = arith.constant 0 : index
    %c5 = arith.constant 5 : index
    %c0_48 = arith.constant 0 : index
    %166 = vector.load %arg8[%c0_47, %c5, %c0_48] : memref<1x16x4xf32, #tpu.memory_space<vmem>>, vector<1x1x4xf32>
    %167 = vector.shape_cast %166 : vector<1x1x4xf32> to vector<1x4xf32>
    %168 = vector.shape_cast %165 : vector<1x4xf32> to vector<1x1x4xf32>
    tpu.vector_store %arg8[%c0_47, %c5, %c0_48], %168 {strides = array<i32>} : memref<1x16x4xf32, #tpu.memory_space<vmem>>, vector<1x1x4xf32>,
    %cst_49 = arith.constant 0xFF800000 : f32
    %169 = vector.shape_cast %37 : vector<16x1xi1> to vector<16x1xi1>
    %170 = vector.broadcast %169 : vector<16x1xi1> to vector<16x4xi1>
    %171 = vector.broadcast %cst_49 : f32 to vector<16x4xf32>
    %172 = arith.select %170, %143, %171 : vector<16x4xi1>, vector<16x4xf32>
    %cst_50 = arith.constant dense<0xFF800000> : vector<4xf32>
    %173 = vector.multi_reduction <maximumf>, %172, %cst_50 [0] : vector<16x4xf32> to vector<4xf32>
    %174 = vector.shape_cast %173 : vector<4xf32> to vector<1x4xf32>
    %175 = arith.ori %144, %38 : i1
    %cst_51 = arith.constant 0.000000e+00 : f32
    %176 = vector.broadcast %cst_51 : f32 to vector<1x4xf32>
    %177 = arith.select %175, %176, %174 : vector<1x4xf32>
    %c0_52 = arith.constant 0 : index
    %c6 = arith.constant 6 : index
    %c0_53 = arith.constant 0 : index
    %178 = vector.load %arg8[%c0_52, %c6, %c0_53] : memref<1x16x4xf32, #tpu.memory_space<vmem>>, vector<1x1x4xf32>
    %179 = vector.shape_cast %178 : vector<1x1x4xf32> to vector<1x4xf32>
    %180 = vector.shape_cast %177 : vector<1x4xf32> to vector<1x1x4xf32>
    tpu.vector_store %arg8[%c0_52, %c6, %c0_53], %180 {strides = array<i32>} : memref<1x16x4xf32, #tpu.memory_space<vmem>>, vector<1x1x4xf32>,
    %cst_54 = arith.constant 0xFF800000 : f32
    %181 = vector.shape_cast %49 : vector<16x1xi1> to vector<16x1xi1>
    %182 = vector.broadcast %181 : vector<16x1xi1> to vector<16x4xi1>
    %183 = vector.broadcast %cst_54 : f32 to vector<16x4xf32>
    %184 = arith.select %182, %143, %183 : vector<16x4xi1>, vector<16x4xf32>
    %cst_55 = arith.constant dense<0xFF800000> : vector<4xf32>
    %185 = vector.multi_reduction <maximumf>, %184, %cst_55 [0] : vector<16x4xf32> to vector<4xf32>
    %186 = vector.shape_cast %185 : vector<4xf32> to vector<1x4xf32>
    %187 = arith.ori %144, %50 : i1
    %cst_56 = arith.constant 0.000000e+00 : f32
    %188 = vector.broadcast %cst_56 : f32 to vector<1x4xf32>
    %189 = arith.select %187, %188, %186 : vector<1x4xf32>
    %c0_57 = arith.constant 0 : index
    %c7 = arith.constant 7 : index
    %c0_58 = arith.constant 0 : index
    %190 = vector.load %arg8[%c0_57, %c7, %c0_58] : memref<1x16x4xf32, #tpu.memory_space<vmem>>, vector<1x1x4xf32>
    %191 = vector.shape_cast %190 : vector<1x1x4xf32> to vector<1x4xf32>
    %192 = vector.shape_cast %189 : vector<1x4xf32> to vector<1x1x4xf32>
    tpu.vector_store %arg8[%c0_57, %c7, %c0_58], %192 {strides = array<i32>} : memref<1x16x4xf32, #tpu.memory_space<vmem>>, vector<1x1x4xf32>,
    %c2_i32_59 = arith.constant 2 : i32
    %193 = arith.addi %0, %c2_i32_59 : i32
    %194 = arith.index_cast %193 : i32 to index
    %195 = memref.load %arg2[%194] : memref<32xi32, #tpu.memory_space<smem>>
    %c2_i32_60 = arith.constant 2 : i32
    %196 = arith.addi %0, %c2_i32_60 : i32
    %197 = arith.index_cast %196 : i32 to index
    %198 = memref.load %arg3[%197] : memref<32xi32, #tpu.memory_space<smem>>
    %c2_i32_61 = arith.constant 2 : i32
    %199 = arith.addi %0, %c2_i32_61 : i32
    %200 = arith.index_cast %199 : i32 to index
    %201 = memref.load %arg4[%200] : memref<32xi32, #tpu.memory_space<smem>>
    %c0_62 = arith.constant 0 : index
    %202 = arith.index_cast %195 : i32 to index
    %c0_63 = arith.constant 0 : index
    %c0_64 = arith.constant 0 : index
    %203 = vector.load %arg7[%c0_62, %202, %c0_63, %c0_64] : memref<1x16x16x4xf32, #tpu.memory_space<vmem>>, vector<1x6x16x4xf32>
    %204 = vector.shape_cast %203 : vector<1x6x16x4xf32> to vector<6x16x4xf32>
    %205 = vector.broadcast %198 : i32 to vector<6x1x1xi32>
    %206 = arith.cmpi sge, %1, %205 : vector<6x1x1xi32>
    %207 = vector.broadcast %201 : i32 to vector<6x1x1xi32>
    %208 = arith.cmpi slt, %1, %207 : vector<6x1x1xi32>
    %209 = arith.andi %206, %208 : vector<6x1x1xi1>
    %cst_65 = arith.constant 0xFF800000 : f32
    %210 = vector.shape_cast %209 : vector<6x1x1xi1> to vector<6x1x1xi1>
    %211 = vector.broadcast %210 : vector<6x1x1xi1> to vector<6x16x4xi1>
    %212 = vector.broadcast %cst_65 : f32 to vector<6x16x4xf32>
    %213 = arith.select %211, %204, %212 : vector<6x16x4xi1>, vector<6x16x4xf32>
    %cst_66 = arith.constant dense<0xFF800000> : vector<16x4xf32>
    %214 = vector.multi_reduction <maximumf>, %213, %cst_66 [0] : vector<6x16x4xf32> to vector<16x4xf32>
    %215 = arith.cmpi sle, %201, %198 : i32
    %cst_67 = arith.constant 0xFF800000 : f32
    %216 = vector.shape_cast %13 : vector<16x1xi1> to vector<16x1xi1>
    %217 = vector.broadcast %216 : vector<16x1xi1> to vector<16x4xi1>
    %218 = vector.broadcast %cst_67 : f32 to vector<16x4xf32>
    %219 = arith.select %217, %214, %218 : vector<16x4xi1>, vector<16x4xf32>
    %cst_68 = arith.constant dense<0xFF800000> : vector<4xf32>
    %220 = vector.multi_reduction <maximumf>, %219, %cst_68 [0] : vector<16x4xf32> to vector<4xf32>
    %221 = vector.shape_cast %220 : vector<4xf32> to vector<1x4xf32>
    %222 = arith.ori %215, %14 : i1
    %cst_69 = arith.constant 0.000000e+00 : f32
    %223 = vector.broadcast %cst_69 : f32 to vector<1x4xf32>
    %224 = arith.select %222, %223, %221 : vector<1x4xf32>
    %c0_70 = arith.constant 0 : index
    %c8 = arith.constant 8 : index
    %c0_71 = arith.constant 0 : index
    %225 = vector.load %arg8[%c0_70, %c8, %c0_71] : memref<1x16x4xf32, #tpu.memory_space<vmem>>, vector<1x1x4xf32>
    %226 = vector.shape_cast %225 : vector<1x1x4xf32> to vector<1x4xf32>
    %227 = vector.shape_cast %224 : vector<1x4xf32> to vector<1x1x4xf32>
    tpu.vector_store %arg8[%c0_70, %c8, %c0_71], %227 {strides = array<i32>} : memref<1x16x4xf32, #tpu.memory_space<vmem>>, vector<1x1x4xf32>,
    %cst_72 = arith.constant 0xFF800000 : f32
    %228 = vector.shape_cast %25 : vector<16x1xi1> to vector<16x1xi1>
    %229 = vector.broadcast %228 : vector<16x1xi1> to vector<16x4xi1>
    %230 = vector.broadcast %cst_72 : f32 to vector<16x4xf32>
    %231 = arith.select %229, %214, %230 : vector<16x4xi1>, vector<16x4xf32>
    %cst_73 = arith.constant dense<0xFF800000> : vector<4xf32>
    %232 = vector.multi_reduction <maximumf>, %231, %cst_73 [0] : vector<16x4xf32> to vector<4xf32>
    %233 = vector.shape_cast %232 : vector<4xf32> to vector<1x4xf32>
    %234 = arith.ori %215, %26 : i1
    %cst_74 = arith.constant 0.000000e+00 : f32
    %235 = vector.broadcast %cst_74 : f32 to vector<1x4xf32>
    %236 = arith.select %234, %235, %233 : vector<1x4xf32>
    %c0_75 = arith.constant 0 : index
    %c9 = arith.constant 9 : index
    %c0_76 = arith.constant 0 : index
    %237 = vector.load %arg8[%c0_75, %c9, %c0_76] : memref<1x16x4xf32, #tpu.memory_space<vmem>>, vector<1x1x4xf32>
    %238 = vector.shape_cast %237 : vector<1x1x4xf32> to vector<1x4xf32>
    %239 = vector.shape_cast %236 : vector<1x4xf32> to vector<1x1x4xf32>
    tpu.vector_store %arg8[%c0_75, %c9, %c0_76], %239 {strides = array<i32>} : memref<1x16x4xf32, #tpu.memory_space<vmem>>, vector<1x1x4xf32>,
    %cst_77 = arith.constant 0xFF800000 : f32
    %240 = vector.shape_cast %37 : vector<16x1xi1> to vector<16x1xi1>
    %241 = vector.broadcast %240 : vector<16x1xi1> to vector<16x4xi1>
    %242 = vector.broadcast %cst_77 : f32 to vector<16x4xf32>
    %243 = arith.select %241, %214, %242 : vector<16x4xi1>, vector<16x4xf32>
    %cst_78 = arith.constant dense<0xFF800000> : vector<4xf32>
    %244 = vector.multi_reduction <maximumf>, %243, %cst_78 [0] : vector<16x4xf32> to vector<4xf32>
    %245 = vector.shape_cast %244 : vector<4xf32> to vector<1x4xf32>
    %246 = arith.ori %215, %38 : i1
    %cst_79 = arith.constant 0.000000e+00 : f32
    %247 = vector.broadcast %cst_79 : f32 to vector<1x4xf32>
    %248 = arith.select %246, %247, %245 : vector<1x4xf32>
    %c0_80 = arith.constant 0 : index
    %c10 = arith.constant 10 : index
    %c0_81 = arith.constant 0 : index
    %249 = vector.load %arg8[%c0_80, %c10, %c0_81] : memref<1x16x4xf32, #tpu.memory_space<vmem>>, vector<1x1x4xf32>
    %250 = vector.shape_cast %249 : vector<1x1x4xf32> to vector<1x4xf32>
    %251 = vector.shape_cast %248 : vector<1x4xf32> to vector<1x1x4xf32>
    tpu.vector_store %arg8[%c0_80, %c10, %c0_81], %251 {strides = array<i32>} : memref<1x16x4xf32, #tpu.memory_space<vmem>>, vector<1x1x4xf32>,
    %cst_82 = arith.constant 0xFF800000 : f32
    %252 = vector.shape_cast %49 : vector<16x1xi1> to vector<16x1xi1>
    %253 = vector.broadcast %252 : vector<16x1xi1> to vector<16x4xi1>
    %254 = vector.broadcast %cst_82 : f32 to vector<16x4xf32>
    %255 = arith.select %253, %214, %254 : vector<16x4xi1>, vector<16x4xf32>
    %cst_83 = arith.constant dense<0xFF800000> : vector<4xf32>
    %256 = vector.multi_reduction <maximumf>, %255, %cst_83 [0] : vector<16x4xf32> to vector<4xf32>
    %257 = vector.shape_cast %256 : vector<4xf32> to vector<1x4xf32>
    %258 = arith.ori %215, %50 : i1
    %cst_84 = arith.constant 0.000000e+00 : f32
    %259 = vector.broadcast %cst_84 : f32 to vector<1x4xf32>
    %260 = arith.select %258, %259, %257 : vector<1x4xf32>
    %c0_85 = arith.constant 0 : index
    %c11 = arith.constant 11 : index
    %c0_86 = arith.constant 0 : index
    %261 = vector.load %arg8[%c0_85, %c11, %c0_86] : memref<1x16x4xf32, #tpu.memory_space<vmem>>, vector<1x1x4xf32>
    %262 = vector.shape_cast %261 : vector<1x1x4xf32> to vector<1x4xf32>
    %263 = vector.shape_cast %260 : vector<1x4xf32> to vector<1x1x4xf32>
    tpu.vector_store %arg8[%c0_85, %c11, %c0_86], %263 {strides = array<i32>} : memref<1x16x4xf32, #tpu.memory_space<vmem>>, vector<1x1x4xf32>,
    %c3_i32_87 = arith.constant 3 : i32
    %264 = arith.addi %0, %c3_i32_87 : i32
    %265 = arith.index_cast %264 : i32 to index
    %266 = memref.load %arg2[%265] : memref<32xi32, #tpu.memory_space<smem>>
    %c3_i32_88 = arith.constant 3 : i32
    %267 = arith.addi %0, %c3_i32_88 : i32
    %268 = arith.index_cast %267 : i32 to index
    %269 = memref.load %arg3[%268] : memref<32xi32, #tpu.memory_space<smem>>
    %c3_i32_89 = arith.constant 3 : i32
    %270 = arith.addi %0, %c3_i32_89 : i32
    %271 = arith.index_cast %270 : i32 to index
    %272 = memref.load %arg4[%271] : memref<32xi32, #tpu.memory_space<smem>>
    %c0_90 = arith.constant 0 : index
    %273 = arith.index_cast %266 : i32 to index
    %c0_91 = arith.constant 0 : index
    %c0_92 = arith.constant 0 : index
    %274 = vector.load %arg7[%c0_90, %273, %c0_91, %c0_92] : memref<1x16x16x4xf32, #tpu.memory_space<vmem>>, vector<1x6x16x4xf32>
    %275 = vector.shape_cast %274 : vector<1x6x16x4xf32> to vector<6x16x4xf32>
    %276 = vector.broadcast %269 : i32 to vector<6x1x1xi32>
    %277 = arith.cmpi sge, %1, %276 : vector<6x1x1xi32>
    %278 = vector.broadcast %272 : i32 to vector<6x1x1xi32>
    %279 = arith.cmpi slt, %1, %278 : vector<6x1x1xi32>
    %280 = arith.andi %277, %279 : vector<6x1x1xi1>
    %cst_93 = arith.constant 0xFF800000 : f32
    %281 = vector.shape_cast %280 : vector<6x1x1xi1> to vector<6x1x1xi1>
    %282 = vector.broadcast %281 : vector<6x1x1xi1> to vector<6x16x4xi1>
    %283 = vector.broadcast %cst_93 : f32 to vector<6x16x4xf32>
    %284 = arith.select %282, %275, %283 : vector<6x16x4xi1>, vector<6x16x4xf32>
    %cst_94 = arith.constant dense<0xFF800000> : vector<16x4xf32>
    %285 = vector.multi_reduction <maximumf>, %284, %cst_94 [0] : vector<6x16x4xf32> to vector<16x4xf32>
    %286 = arith.cmpi sle, %272, %269 : i32
    %cst_95 = arith.constant 0xFF800000 : f32
    %287 = vector.shape_cast %13 : vector<16x1xi1> to vector<16x1xi1>
    %288 = vector.broadcast %287 : vector<16x1xi1> to vector<16x4xi1>
    %289 = vector.broadcast %cst_95 : f32 to vector<16x4xf32>
    %290 = arith.select %288, %285, %289 : vector<16x4xi1>, vector<16x4xf32>
    %cst_96 = arith.constant dense<0xFF800000> : vector<4xf32>
    %291 = vector.multi_reduction <maximumf>, %290, %cst_96 [0] : vector<16x4xf32> to vector<4xf32>
    %292 = vector.shape_cast %291 : vector<4xf32> to vector<1x4xf32>
    %293 = arith.ori %286, %14 : i1
    %cst_97 = arith.constant 0.000000e+00 : f32
    %294 = vector.broadcast %cst_97 : f32 to vector<1x4xf32>
    %295 = arith.select %293, %294, %292 : vector<1x4xf32>
    %c0_98 = arith.constant 0 : index
    %c12 = arith.constant 12 : index
    %c0_99 = arith.constant 0 : index
    %296 = vector.load %arg8[%c0_98, %c12, %c0_99] : memref<1x16x4xf32, #tpu.memory_space<vmem>>, vector<1x1x4xf32>
    %297 = vector.shape_cast %296 : vector<1x1x4xf32> to vector<1x4xf32>
    %298 = vector.shape_cast %295 : vector<1x4xf32> to vector<1x1x4xf32>
    tpu.vector_store %arg8[%c0_98, %c12, %c0_99], %298 {strides = array<i32>} : memref<1x16x4xf32, #tpu.memory_space<vmem>>, vector<1x1x4xf32>,
    %cst_100 = arith.constant 0xFF800000 : f32
    %299 = vector.shape_cast %25 : vector<16x1xi1> to vector<16x1xi1>
    %300 = vector.broadcast %299 : vector<16x1xi1> to vector<16x4xi1>
    %301 = vector.broadcast %cst_100 : f32 to vector<16x4xf32>
    %302 = arith.select %300, %285, %301 : vector<16x4xi1>, vector<16x4xf32>
    %cst_101 = arith.constant dense<0xFF800000> : vector<4xf32>
    %303 = vector.multi_reduction <maximumf>, %302, %cst_101 [0] : vector<16x4xf32> to vector<4xf32>
    %304 = vector.shape_cast %303 : vector<4xf32> to vector<1x4xf32>
    %305 = arith.ori %286, %26 : i1
    %cst_102 = arith.constant 0.000000e+00 : f32
    %306 = vector.broadcast %cst_102 : f32 to vector<1x4xf32>
    %307 = arith.select %305, %306, %304 : vector<1x4xf32>
    %c0_103 = arith.constant 0 : index
    %c13 = arith.constant 13 : index
    %c0_104 = arith.constant 0 : index
    %308 = vector.load %arg8[%c0_103, %c13, %c0_104] : memref<1x16x4xf32, #tpu.memory_space<vmem>>, vector<1x1x4xf32>
    %309 = vector.shape_cast %308 : vector<1x1x4xf32> to vector<1x4xf32>
    %310 = vector.shape_cast %307 : vector<1x4xf32> to vector<1x1x4xf32>
    tpu.vector_store %arg8[%c0_103, %c13, %c0_104], %310 {strides = array<i32>} : memref<1x16x4xf32, #tpu.memory_space<vmem>>, vector<1x1x4xf32>,
    %cst_105 = arith.constant 0xFF800000 : f32
    %311 = vector.shape_cast %37 : vector<16x1xi1> to vector<16x1xi1>
    %312 = vector.broadcast %311 : vector<16x1xi1> to vector<16x4xi1>
    %313 = vector.broadcast %cst_105 : f32 to vector<16x4xf32>
    %314 = arith.select %312, %285, %313 : vector<16x4xi1>, vector<16x4xf32>
    %cst_106 = arith.constant dense<0xFF800000> : vector<4xf32>
    %315 = vector.multi_reduction <maximumf>, %314, %cst_106 [0] : vector<16x4xf32> to vector<4xf32>
    %316 = vector.shape_cast %315 : vector<4xf32> to vector<1x4xf32>
    %317 = arith.ori %286, %38 : i1
    %cst_107 = arith.constant 0.000000e+00 : f32
    %318 = vector.broadcast %cst_107 : f32 to vector<1x4xf32>
    %319 = arith.select %317, %318, %316 : vector<1x4xf32>
    %c0_108 = arith.constant 0 : index
    %c14 = arith.constant 14 : index
    %c0_109 = arith.constant 0 : index
    %320 = vector.load %arg8[%c0_108, %c14, %c0_109] : memref<1x16x4xf32, #tpu.memory_space<vmem>>, vector<1x1x4xf32>
    %321 = vector.shape_cast %320 : vector<1x1x4xf32> to vector<1x4xf32>
    %322 = vector.shape_cast %319 : vector<1x4xf32> to vector<1x1x4xf32>
    tpu.vector_store %arg8[%c0_108, %c14, %c0_109], %322 {strides = array<i32>} : memref<1x16x4xf32, #tpu.memory_space<vmem>>, vector<1x1x4xf32>,
    %cst_110 = arith.constant 0xFF800000 : f32
    %323 = vector.shape_cast %49 : vector<16x1xi1> to vector<16x1xi1>
    %324 = vector.broadcast %323 : vector<16x1xi1> to vector<16x4xi1>
    %325 = vector.broadcast %cst_110 : f32 to vector<16x4xf32>
    %326 = arith.select %324, %285, %325 : vector<16x4xi1>, vector<16x4xf32>
    %cst_111 = arith.constant dense<0xFF800000> : vector<4xf32>
    %327 = vector.multi_reduction <maximumf>, %326, %cst_111 [0] : vector<16x4xf32> to vector<4xf32>
    %328 = vector.shape_cast %327 : vector<4xf32> to vector<1x4xf32>
    %329 = arith.ori %286, %50 : i1
    %cst_112 = arith.constant 0.000000e+00 : f32
    %330 = vector.broadcast %cst_112 : f32 to vector<1x4xf32>
    %331 = arith.select %329, %330, %328 : vector<1x4xf32>
    %c0_113 = arith.constant 0 : index
    %c15 = arith.constant 15 : index
    %c0_114 = arith.constant 0 : index
    %332 = vector.load %arg8[%c0_113, %c15, %c0_114] : memref<1x16x4xf32, #tpu.memory_space<vmem>>, vector<1x1x4xf32>
    %333 = vector.shape_cast %332 : vector<1x1x4xf32> to vector<1x4xf32>
    %334 = vector.shape_cast %331 : vector<1x4xf32> to vector<1x1x4xf32>
    tpu.vector_store %arg8[%c0_113, %c15, %c0_114], %334 {strides = array<i32>} : memref<1x16x4xf32, #tpu.memory_space<vmem>>, vector<1x1x4xf32>,
    return
  }
  func.func @transform_0(%arg0: i32, %arg1: memref<8xi32, #tpu.memory_space<smem>>) -> i32 {
    %c0_i32 = arith.constant 0 : i32
    %c0_i32_0 = arith.constant 0 : i32
    return %c0_i32 : i32
  }
  func.func @transform_1(%arg0: i32, %arg1: memref<8xi32, #tpu.memory_space<smem>>) -> i32 {
    %c0_i32 = arith.constant 0 : i32
    %c0_i32_0 = arith.constant 0 : i32
    return %c0_i32 : i32
  }
  func.func @transform_2(%arg0: i32, %arg1: memref<8xi32, #tpu.memory_space<smem>>) -> i32 {
    %c0_i32 = arith.constant 0 : i32
    %c0_i32_0 = arith.constant 0 : i32
    return %c0_i32 : i32
  }
  func.func @transform_3(%arg0: i32, %arg1: memref<8xi32, #tpu.memory_space<smem>>) -> i32 {
    %c0_i32 = arith.constant 0 : i32
    %c0_i32_0 = arith.constant 0 : i32
    return %c0_i32 : i32
  }
  func.func @transform_4(%arg0: i32, %arg1: memref<8xi32, #tpu.memory_space<smem>>) -> i32 {
    %c0_i32 = arith.constant 0 : i32
    %c0_i32_0 = arith.constant 0 : i32
    return %c0_i32 : i32
  }
  func.func @transform_5(%arg0: i32, %arg1: memref<8xi32, #tpu.memory_space<smem>>) -> (i32, i32, i32, i32) {
    %0 = arith.index_cast %arg0 : i32 to index
    %1 = memref.load %arg1[%0] : memref<8xi32, #tpu.memory_space<smem>>
    %c0_i32 = arith.constant 0 : i32
    %c0_i32_0 = arith.constant 0 : i32
    %c0_i32_1 = arith.constant 0 : i32
    %c0_i32_2 = arith.constant 0 : i32
    return %1, %c0_i32, %c0_i32_0, %c0_i32_1 : i32, i32, i32, i32
  }
  func.func @transform_6(%arg0: i32, %arg1: memref<8xi32, #tpu.memory_space<smem>>) -> (i32, i32, i32) {
    %c0_i32 = arith.constant 0 : i32
    %c0_i32_0 = arith.constant 0 : i32
    %c0_i32_1 = arith.constant 0 : i32
    return %arg0, %c0_i32, %c0_i32_0 : i32, i32, i32
  }
}

</mosaic_0001>

<bundles_post_ra>
// kernel: tpu_custom_call.1
= control target key start
LH: loop header
LB: loop body
LE: loop exit
PB: predicated region body
PF: predicated region fallthrough
CT: control target
= control target key end

     0   :  { %s2531_s0 = inlined_call_operand.vmem [shape: s32[8], index: 0, kind: input, shape index: {}]   ;;  %s2532_s1 = inlined_call_operand.vmem [shape: s32[32], index: 1, kind: input, shape index: {}]   ;;  %s2533_s2 = inlined_call_operand.vmem [shape: s32[32], index: 2, kind: input, shape index: {}]   ;;  %s2534_s3 = inlined_call_operand.vmem [shape: s32[32], index: 3, kind: input, shape index: {}]   ;;  %s2535_s4 = inlined_call_operand.vmem [shape: s32[32], index: 4, kind: input, shape index: {}]   ;;  %s2536_s5 = inlined_call_operand.vmem [shape: s32[32], index: 5, kind: input, shape index: {}]   ;;  %s2537_s6 = inlined_call_operand.vmem [shape: f32[2,16,16,4], index: 6, kind: input, shape index: {}]   ;;  %s2538_s7 = inlined_call_operand.vmem [shape: f32[8,16,4], index: 7, kind: output, shape index: {}]  }
   0x1   :  { %2543 = sst [smem:[#allocation16_spill]] %s2532_s1  ;;  %s12_s26 = sshll.u32 %s2531_s0, 4  ;;  %s13_s26 = int_to_ptr.vmem [resolvable:$true] %s12_s26 }
   0x2   :  { %2544 = sst [smem:[#allocation17_spill]] %s2533_s2  ;;  %s1208_s27 = scalar_lea.vmem %s13_s26, 16 }
   0x3   :  { %2545 = sst [smem:[#allocation18_spill]] %s2534_s3  ;;  %p1209_p0 = scmp.ne.s32.totalorder %s13_s26, %s1208_s27 }
   0x4   :  { %p1213_p1 = scmp.lt.s32.totalorder %s13_s26, %s13_s26  ;;  %p1214_p2 = scmp.lt.s32.totalorder %s1208_s27, %s1208_s27 }
   0x6   :  { %p1215_p3 = por %p1214_p2, %p1213_p1 }
   0x8   :  { %p1216_p4 = pnand %p1215_p3, %p1209_p0 }
   0xa   :  { %1219 = shalt.err (!%p1216_p4)  }
   0xb   :  { %s1317_s28 = smov [#allocation3]  }
   0xc   :  { %15 = dma.vmem_to_smem %s13_s26, 16, %s1317_s28, [#allocation2] }
   0xd   :  { %1299 = dma.done.wait [#allocation2], 16 }
   0xe   :  { %1300 = vsyncadd [#allocation2], 4294967280 }
   0xf   :  { %17 = sfence }
  0x10   :  { %18 = vsyncpa [#allocation5], 0 }
  0x11   :  { %19 = vsyncpa [#allocation7], 0 }
  0x12   :  { %20 = vsyncpa [#allocation10], 0  ;;  %s1366_s29 = smov 0  }
  0x13 LB: > { %s2546_s2 = sld [smem:[#allocation17_spill]]  ;;  %s1375_s9 = sadd.s32 4294967295, %s1315_s29   ;;  %s1315_s29 = sphi %s1366_s29, %s26_s29  }
  0x14   : > { %p1122_p5 = scmp.ge.s32.totalorder %s1315_s29, 1  ;;  %p190_p6 = scmp.lt.s32.totalorder %s1315_s29, 9 }
  0x15   : > { %p2539_p7 = scmp.eq.s32.totalorder %s1375_s9, 0  ;;  %s236_s13 = sshll.u32 %s2535_s4, 4  ;;  %s1387_s13 = int_to_ptr.vmem [resolvable:$true] %s236_s13 }
  0x16   : > { %p1380_p8 = pnand %p1122_p5, %p190_p6  ;;  %s2548_s1 = sld [smem:[#allocation16_spill]] }
  0x17   : > { %s2550_s3 = sld [smem:[#allocation18_spill]]  ;;  %s247_s23 = sshll.u32 %s2536_s5, 4  ;;  %s248_s23 = int_to_ptr.vmem [resolvable:$true] %s247_s23 }
  0x18   : > { %p1168_p9 = pneg %p1380_p8 }
  0x19   : > { %s214_s8 = sshll.u32 %s2546_s2, 4  ;;  %s215_s8 = int_to_ptr.vmem [resolvable:$true] %s214_s8 }
  0x1a   : > { %p1398_p10 = pnand %p2539_p7, %p1168_p9  ;;  %s1220_s24 = scalar_lea.vmem %s215_s8, 16 }
  0x1b   : > { %p1221_p11 = scmp.ne.s32.totalorder %s215_s8, %s1220_s24  ;;  %p1228_p1 = scmp.lt.s32.totalorder %s215_s8, %s215_s8 }
  0x1c   : > { %s203_s16 = sshll.u32 %s2548_s1, 4  ;;  %p1412_p12 = pneg %p1398_p10  ;;  %s1394_s16 = int_to_ptr.vmem [resolvable:$true] %s203_s16 }
  0x1d   : > { %s225_s20 = sshll.u32 %s2550_s3, 4  ;;  %p1229_p2 = scmp.lt.s32.totalorder %s1220_s24, %s1220_s24  ;;  %s1405_s20 = int_to_ptr.vmem [resolvable:$true] %s225_s20 }
  0x1e   : > { %p1223_p13 = pnand %p1412_p12, %p1221_p11 }
  0x1f   : > { %p1230_p3 = por %p1229_p2, %p1228_p1 }
  0x20   : > { %p1224_p0 = pneg %p1223_p13 }
  0x22   : > { %p1231_p4 = pnand %p1230_p3, %p1224_p0 }
  0x24   : > { %1234 = shalt.err (!%p1231_p4)
}
  0x25   : > { %s1318_s26 = smov [#allocation6]   ;;  %s1235_s27 = scalar_lea.vmem %s1387_s13, 16 }
  0x26   : > { %1174 = dma.vmem_to_smem (!%p1398_p10), %s215_s8, 16, %s1318_s26, [#allocation7]  }
  0x27   : > { %p1236_p5 = scmp.ne.s32.totalorder %s1387_s13, %s1235_s27  ;;  %p1243_p11 = scmp.lt.s32.totalorder %s1387_s13, %s1387_s13 }
  0x28   : > { %p1244_p13 = scmp.lt.s32.totalorder %s1235_s27, %s1235_s27 }
  0x29   : > { %p1238_p6 = pnand %p1236_p5, %p1412_p12 }
  0x2a   : > { %p1245_p7 = por %p1244_p13, %p1243_p11 }
  0x2b   : > { %p1239_p9 = pneg %p1238_p6 }
  0x2d   : > { %p1246_p1 = pnand %p1245_p7, %p1239_p9 }
  0x2f   : > { %1249 = shalt.err (!%p1246_p1)
}
  0x30   : > { %s1319_s28 = smov [#allocation9]   ;;  %s1250_s0 = scalar_lea.vmem %s1394_s16, 16 }
  0x31   : > { %1180 = dma.vmem_to_smem (!%p1398_p10), %s1387_s13, 16, %s1319_s28, [#allocation10]  }
  0x32   : > { %p1251_p0 = scmp.ne.s32.totalorder %s1394_s16, %s1250_s0  ;;  %p1258_p4 = scmp.lt.s32.totalorder %s1394_s16, %s1394_s16 }
  0x33   : > { %p1259_p5 = scmp.lt.s32.totalorder %s1250_s0, %s1250_s0 }
  0x34   : > { %p1253_p2 = pnand %p1251_p0, %p1412_p12 }
  0x35   : > { %p1260_p6 = por %p1259_p5, %p1258_p4 }
  0x36   : > { %p1254_p3 = pneg %p1253_p2 }
  0x38   : > { %p1261_p7 = pnand %p1260_p6, %p1254_p3 }
  0x3a   : > { %1264 = shalt.err (!%p1261_p7)
}
  0x3b   : > { %s1320_s30 = smov [#allocation4]   ;;  %s1265_s8 = scalar_lea.vmem %s1405_s20, 16 }
  0x3c   : > { %1171 = dma.vmem_to_smem (!%p1398_p10), %s1394_s16, 16, %s1320_s30, [#allocation5]  }
  0x3d   : > { %p1266_p9 = scmp.ne.s32.totalorder %s1405_s20, %s1265_s8  ;;  %p1273_p1 = scmp.lt.s32.totalorder %s1405_s20, %s1405_s20 }
  0x3e   : > { %p1274_p0 = scmp.lt.s32.totalorder %s1265_s8, %s1265_s8 }
  0x3f   : > { %p1268_p11 = pnand %p1266_p9, %p1412_p12 }
  0x40   : > { %p1275_p2 = por %p1274_p0, %p1273_p1 }
  0x41   : > { %p1269_p13 = pneg %p1268_p11 }
  0x43   : > { %p1276_p3 = pnand %p1275_p2, %p1269_p13 }
  0x45   : > { %1279 = shalt.err (!%p1276_p3)
}
  0x46   : > { %s1321_s11 = smov [#allocation8]   ;;  %s1280_s14 = scalar_lea.vmem %s248_s23, 16 }
  0x47   : > { %1177 = dma.vmem_to_smem (!%p1398_p10), %s1405_s20, 16, %s1321_s11, [#allocation7]  }
  0x48   : > { %p1281_p4 = scmp.ne.s32.totalorder %s248_s23, %s1280_s14  ;;  %p1288_p7 = scmp.lt.s32.totalorder %s248_s23, %s248_s23 }
  0x49   : > { %p1289_p9 = scmp.lt.s32.totalorder %s1280_s14, %s1280_s14 }
  0x4a   : > { %p1283_p5 = pnand %p1281_p4, %p1412_p12 }
  0x4b   : > { %p1290_p11 = por %p1289_p9, %p1288_p7 }
  0x4c   : > { %p1284_p6 = pneg %p1283_p5 }
  0x4e   : > { %p1291_p13 = pnand %p1290_p11, %p1284_p6 }
  0x50   : > { %1294 = shalt.err (!%p1291_p13)
}
  0x51   : > { %s1322_s15 = smov [#allocation11]   ;;  %270 = sbr.rel (%p1380_p8) target bundleno = 248 (0xf8), region = 44 }
  0x52   : > { %1183 = dma.vmem_to_smem (!%p1398_p10), %s248_s23, 16, %s1322_s15, [#allocation10]  }
  0x53   : > { %p2552_p1 = scmp.eq.s32.totalorder (!%p1380_p8), %s1375_s9, 0 }
  0x58   : > { %1302 = dma.done.wait (%p2552_p1), [#allocation5], 16   ;;  %p2553_p0 = pmov %p2552_p1 }
  0x5a   : > { %1304 = vsyncadd (%p2553_p0), [#allocation5], 4294967280  ;;  %p2554_p12 = pmov %p2553_p0 }
  0x5b   : > { %p2555_p2 = pmov %p2553_p0 }
  0x5c   : > { %1306 = dma.done.wait (%p2554_p12), [#allocation7], 32  }
  0x5d   : > { %1308 = vsyncadd (%p2555_p2), [#allocation7], 4294967264  ;;  %p2556_p3 = pmov %p2553_p0 }
  0x5e   : > { %p2557_p10 = pmov %p2553_p0 }
  0x5f   : > { %1310 = dma.done.wait (%p2556_p3), [#allocation10], 32  }
  0x60   : > { %1312 = vsyncadd (%p2557_p10), [#allocation10], 4294967264 }
  0x61   : > { %292 = sfence }
  0x62   : > { %s318_s10 = sld [smem:[#allocation3 + %s1375_s9]]  ;;  %s1471_s16 = sshll.u32 %s1375_s9, 2  ;;  %v331_v0 = vlaneseq  ;;  %vm2540_vm1 = vcmask 31744  }
  0x63   : > { %s1474_s17 = sld [smem:[#allocation9 + %s1471_s16]]  ;;  %s1487_s22 = sadd.s32 1, %s1471_s16 }
  0x64   : > { %s1477_s18 = sld [smem:[#allocation11 + %s1471_s16]]  ;;  %v1489_v1 = vshrl.u32 %v331_v0, 7  ;;  %s1580_s12 = sadd.s32 2, %s1471_s16 }
  0x65   : > { %s381_s19 = sld [smem:[#allocation4 + %s1471_s16]]  ;;  %p325_p12 = scmp.lt.s32.totalorder %s1375_s9, 7 }
  0x66   : > { %s1481_s20 = sld [smem:[#allocation6 + %s1471_s16]]  ;;  %v1509_v4 = vadd.s32 8, %v1489_v1 }
  0x67   : > { %s1484_s21 = sld [smem:[#allocation8 + %s1471_s16]]  ;;  %s2765_s9 = smov (!%p325_p12, %s1375_s9), 7 }
  0x68   : > { %p319_p8 = scmp.lt.s32.totalorder %s318_s10, 1  ;;  %s1494_s23 = sld [smem:[#allocation9 + %s1487_s22]] }
  0x69   : > { %v336_v2 = vstv %s1474_s17  ;;  %s1506_s0 = sld [smem:[#allocation11 + %s1487_s22]] }
  0x6a   : > { %s2763_s10 = smov (!%p319_p8, %s318_s10), 1  ;;  %p344_p4 = scmp.le.s32.totalorder %s1477_s18, %s1474_s17  ;;  %v339_v5 = vstv %s1477_s18  ;;  %vm1520_vm2 = vcmp.ge.s32.totalorder %v1489_v1, %v336_v2  ;;  %vm1544_vm10 = vcmp.ge.s32.totalorder %v1509_v4, %v336_v2 }
  0x6b   : > { %s1146_s24 = sshll.u32 %s2763_s10, 8  ;;  %s1140_s25 = sshll.u32 %s381_s19, 4  ;;  %vm1549_vm11 = vcmp.lt.s32.totalorder %v1489_v1, %v339_v5  ;;  %vm1554_vm12 = vcmp.lt.s32.totalorder %v1509_v4, %v339_v5 }
  0x6c   : > { %s1499_s28 = scalar_lea.vmem %s2537_s6, %s1146_s24  ;;  %v1503_v3 = vstv %s1481_s20  ;;  %s1606_s13 = sld [smem:[#allocation9 + %s1580_s12]] }
  0x6d   : > { %s1512_s30 = scalar_lea.vmem %s1499_s28, %s1140_s25  ;;  %p465_p5 = scmp.le.s32.totalorder %s1484_s21, %s1481_s20  ;;  %vm399_vm0 = vcmp.le.s32.totalorder %v1503_v3, 0  ;;  %v405_v6 = vstv %s1484_s21  ;;  %vm400_vm3 = vcmp.le.s32.totalorder %v1503_v3, 1  ;;  %vm401_vm4 = vcmp.le.s32.totalorder %v1503_v3, 2 }
  0x6e   : > { %vm406_vm6 = vcmp.gt.s32.totalorder %v405_v6, 0  ;;  %v386_v8 = vld [vmem:[%s1512_s30] sm:$0xff]  ;;  %v387_v9 = vld [vmem:[%s1512_s30 + $0x8] sm:$0xff]  ;;  %v388_v10 = vld [vmem:[%s1512_s30 + $0x10] sm:$0xff]  ;;  %vm407_vm9 = vcmp.gt.s32.totalorder %v405_v6, 1  ;;  %v348_v11 = vstv %s1494_s23  ;;  %vm408_vm13 = vcmp.gt.s32.totalorder %v405_v6, 2 }
  0x6f   : > { %p1533_p6 = por %p465_p5, %p344_p4  ;;  %v389_v15 = vld [vmem:[%s1512_s30 + $0x18] sm:$0xff]  ;;  %v390_v16 = vld [vmem:[%s1512_s30 + $0x20] sm:$0xff]  ;;  %vm409_vm14 = vcmp.gt.s32.totalorder %v405_v6, 3  ;;  %v391_v17 = vld [vmem:[%s1512_s30 + $0x28] sm:$0xff]  ;;  %vm410_vm15 = vcmp.gt.s32.totalorder %v405_v6, 4  ;;  %vm1572_vm5 = vcmp.ge.s32.totalorder %v1489_v1, %v348_v11  ;;  %v351_v21 = vstv %s1506_s0  ;;  %p356_p7 = scmp.le.s32.totalorder %s1506_s0, %s1494_s23 }
  0x70   : > { %v392_v18 = vld [vmem:[%s1512_s30 + $0x30] sm:$0xff]  ;;  %vm1567_vm7 = vmand %vm399_vm0, %vm406_vm6  ;;  %v393_v22 = vld [vmem:[%s1512_s30 + $0x38] sm:$0xff]  ;;  %vm1596_vm6 = vcmp.ge.s32.totalorder %v1509_v4, %v348_v11  ;;  %vm1601_vm8 = vcmp.lt.s32.totalorder %v1489_v1, %v351_v21  ;;  %s1609_s14 = sld [smem:[#allocation11 + %s1580_s12]]  ;;  %s1651_s10 = sadd.s32 3, %s1471_s16 }
  0x71   : > { %s482_s11 = scalar_select %p1533_p6, 1, 0  ;;  %v394_v23 = vld [vmem:[%s1512_s30 + $0x40] sm:$0xff]  ;;  %vm1587_vm0 = vmand %vm400_vm3, %vm407_vm9  ;;  %v430_v25 = vsel %vm1567_vm7, %v386_v8, -inf  ;;  %v431_v26 = vsel %vm1567_vm7, %v387_v9, -inf  ;;  %v395_v29 = vld [vmem:[%s1512_s30 + $0x48] sm:$0xff] }
  0x72   : > { %v396_v30 = vld [vmem:[%s1512_s30 + $0x50] sm:$0xff]  ;;  %vm1616_vm3 = vmand %vm401_vm4, %vm408_vm13  ;;  %v432_v32 = vsel %vm1587_vm0, %v388_v10, -inf  ;;  %v433_v33 = vsel %vm1587_vm0, %v389_v15, -inf  ;;  %v443_v34 = vsel %vm2540_vm1, %v430_v25, -inf  ;;  %v454_v35 = vsel %vm2540_vm1, %v431_v26, -inf  ;;  %p1632_p9 = por %p465_p5, %p356_p7  ;;  %v397_v36 = vld [vmem:[%s1512_s30 + $0x58] sm:$0xff] }
  0x73   : > { %vm2580_vm4 = vcmp.le.s32.totalorder %v1503_v3, 3  ;;  %v434_v38 = vsel %vm1616_vm3, %v390_v16, -inf  ;;  %v435_v39 = vsel %vm1616_vm3, %v391_v17, -inf  ;;  %v444_v40 = vsel %vm2540_vm1, %v432_v32, -inf  ;;  %s1681_s19 = sld [smem:[#allocation9 + %s1651_s10]]  ;;  %vm1702_vm3 = vmand %vm1520_vm2, %vm1549_vm11 }
  0x74   : > { %vm1640_vm7 = vmand %vm2580_vm4, %vm409_vm14  ;;  %v455_v41 = vsel %vm2540_vm1, %v433_v33, -inf  ;;  %vm2583_vm9 = vcmp.le.s32.totalorder %v1503_v3, 4  ;;  %v445_v45 = vsel %vm2540_vm1, %v434_v38, -inf  ;;  %v456_v46 = vsel %vm2540_vm1, %v435_v39, -inf  ;;  %s504_s16 = scalar_select %p1632_p9, 1, 0 }
  0x75   : > { %vm1656_vm13 = vmand %vm2583_vm9, %vm410_vm15  ;;  %v436_v43 = vsel %vm1640_vm7, %v392_v18, -inf  ;;  %v437_v44 = vsel %vm1640_vm7, %v393_v22, -inf  ;;  %vm2586_vm14 = vcmp.gt.s32.totalorder %v405_v6, 5  ;;  %vm2587_vm15 = vcmp.le.s32.totalorder %v1503_v3, 5  ;;  %s1689_s24 = sld [smem:[#allocation11 + %s1651_s10]] }
  0x76   : > { %vm1671_vm0 = vmand %vm2587_vm15, %vm2586_vm14  ;;  %v438_v48 = vsel %vm1656_vm13, %v394_v23, -inf  ;;  %v439_v49 = vsel %vm1656_vm13, %v395_v29, -inf  ;;  %v446_v50 = vmax.f32 %v443_v34, %v445_v45  ;;  %v447_v51 = vsel %vm2540_vm1, %v436_v43, -inf  ;;  %s1692_s25 = sld [smem:[#allocation4 + %s1651_s10]]  ;;  %p368_p11 = scmp.le.s32.totalorder %s1609_s14, %s1606_s13 }
  0x77   : > { %v440_v52 = vsel %vm1671_vm0, %v396_v30, -inf  ;;  %v441_v53 = vsel %vm1671_vm0, %v397_v36, -inf  ;;  %v448_v54 = vmax.f32 %v444_v40, %v447_v51  ;;  %v449_v55 = vsel %vm2540_vm1, %v438_v48, -inf  ;;  %s1709_s26 = sld [smem:[#allocation4 + %s1487_s22]]  ;;  %vm1716_vm2 = vmand %vm1572_vm5, %vm1601_vm8 }
  0x78   : > { %v450_v56 = vmax.f32 %v446_v50, %v449_v55  ;;  %v451_v57 = vsel %vm2540_vm1, %v440_v52, -inf  ;;  %v457_v58 = vmax.f32 %v454_v35, %v456_v46  ;;  %v458_v59 = vsel %vm2540_vm1, %v437_v44, -inf  ;;  %p1726_p13 = por %p465_p5, %p368_p11  ;;  %s1731_s30 = sld [smem:[#allocation6 + %s1487_s22]]  ;;  %vm1737_vm11 = vmand %vm1544_vm10, %vm1554_vm12 }
  0x79   : > { %v452_v61 = vmax.f32 %v448_v54, %v451_v57  ;;  %v459_v62 = vmax.f32 %v455_v41, %v458_v59  ;;  %v460_v63 = vsel %vm2540_vm1, %v439_v49, -inf  ;;  %v462_v0 = vsel %vm2540_vm1, %v441_v53, -inf  ;;  %s1822_s20 = sld [smem:[#allocation8 + %s1487_s22]] }
  0x7a   : > { %v461_v2 = vmax.f32 %v457_v58, %v460_v63  ;;  %vm353_vm4 = vcmp.lt.s32.totalorder %v1509_v4, %v351_v21  ;;  %v1746_v8 = vstv %s482_s11  ;;  %v360_v9 = vstv %s1606_s13  ;;  %s525_s8 = scalar_select %p1726_p13, 1, 0 }
  0x7b   : > { %v1741_v6 = vmax.f32 %v450_v56, %v452_v61  ;;  %v463_v7 = vmax.f32 %v459_v62, %v462_v0  ;;  %vm1751_vm5 = vmand %vm1596_vm6, %vm353_vm4  ;;  %v1758_v11 = vstv %s504_s16  ;;  %vm361_vm8 = vcmp.ge.s32.totalorder %v1489_v1, %v360_v9  ;;  %p380_p1 = scmp.le.s32.totalorder %s1689_s24, %s1681_s19  ;;  %s1881_s27 = sld [smem:[#allocation8 + %s1651_s10]] }
  0x7c   : > { %vm1762_vm10 = vcmp.ge.s32.totalorder %v1509_v4, %v360_v9  ;;  %v363_v13 = vstv %s1609_s14  ;;  %s1143_s11 = sshll.u32 %s1692_s25, 4  ;;  %v372_v20 = vstv %s1681_s19  ;;  %v1803_v25 = vstv %s525_s8  ;;  %s1147_s8 = sshll.u32 %s2765_s9, 4 }
  0x7d   : > { %v464_v14 = vmax.f32 %v461_v2, %v463_v7  ;;  %v470_v15 = vsel %vm1702_vm3, %v1741_v6, -inf  ;;  %v492_v16 = vsel %vm1716_vm2, %v1741_v6, -inf  ;;  %vm364_vm12 = vcmp.lt.s32.totalorder %v1489_v1, %v363_v13  ;;  %s1788_s15 = scalar_lea.vmem %s1499_s28, %s1143_s11  ;;  %p1811_p0 = por %p465_p5, %p380_p1 }
  0x7e   : > { %v472_v17 = vsel %vm2540_vm1, %v470_v15, -inf  ;;  %v494_v18 = vsel %vm2540_vm1, %v492_v16, -inf  ;;  %vm365_vm6 = vcmp.lt.s32.totalorder %v1509_v4, %v363_v13  ;;  %vm1782_vm7 = vmand %vm361_vm8, %vm364_vm12  ;;  %vm1826_vm13 = vcmp.ge.s32.totalorder %v1489_v1, %v372_v20  ;;  %s1141_s25 = sshll.u32 %s1709_s26, 4  ;;  %s1878_s26 = sld [smem:[#allocation6 + %s1651_s10]] }
  0x7f   : > { %v471_v21 = vsel %vm1737_vm11, %v464_v14, -inf  ;;  %v493_v22 = vsel %vm1751_vm5, %v464_v14, -inf  ;;  %vm1796_vm9 = vmand %vm1762_vm10, %vm365_vm6  ;;  %v513_v24 = vsel %vm1782_vm7, %v1741_v6, -inf  ;;  %s546_s21 = scalar_select %p1811_p0, 1, 0  ;;  %vm1834_vm14 = vcmp.ge.s32.totalorder %v1509_v4, %v372_v20 }
  0x80   : > { %v473_v26 = vsel %vm2540_vm1, %v471_v21, -inf  ;;  %v495_v27 = vsel %vm2540_vm1, %v493_v22, -inf  ;;  %v514_v28 = vsel %vm1796_vm9, %v464_v14, -inf  ;;  %v515_v29 = vsel %vm2540_vm1, %v513_v24, -inf  ;;  %s1860_s22 = scalar_lea.vmem %s1499_s28, %s1141_s25  ;;  %p634_p2 = scmp.le.s32.totalorder %s1822_s20, %s1731_s30 }
  0x81   : > { %v474_v30 = vmax.f32 %v472_v17, %v473_v26  ;;  %v496_v31 = vmax.f32 %v494_v18, %v495_v27  ;;  %v516_v32 = vsel %vm2540_vm1, %v514_v28, -inf  ;;  %v375_v36 = vstv %s1689_s24  ;;  %v1889_v55 = vld [vmem:[%s1860_s22] sm:$0xff]  ;;  %v1894_v59 = vld [vmem:[%s1860_s22 + $0x8] sm:$0xff]  ;;  %v1897_v61 = vld [vmem:[%s1860_s22 + $0x10] sm:$0xff]  ;;  %s1918_s11 = scalar_lea.vmem %s2538_s7, %s1147_s8  ;;  %s1934_s16 = sld [smem:[#allocation4 + %s1580_s12]] }
  0x82   : > { %v517_v34 = vmax.f32 %v515_v29, %v516_v32  ;;  %v1840_v37 = vstv %s1731_s30  ;;  %vm376_vm15 = vcmp.lt.s32.totalorder %v1489_v1, %v375_v36  ;;  %vm377_vm0 = vcmp.lt.s32.totalorder %v1509_v4, %v375_v36  ;;  %v1900_v62 = vld [vmem:[%s1860_s22 + $0x18] sm:$0xff]  ;;  %v560_v2 = vld [vmem:[%s1860_s22 + $0x20] sm:$0xff]  ;;  %v562_v13 = vld [vmem:[%s1860_s22 + $0x30] sm:$0xff]  ;;  %p1975_p10 = por %p634_p2, %p344_p4  ;;  %p1985_p8 = por %p634_p2, %p356_p7 }
  0x83   : > { %v475_v38 = vrot.slane %v474_v30, 4  ;;  %v497_v39 = vrot.slane %v496_v31, 4  ;;  %vm1853_vm10 = vmand %vm1826_vm13, %vm376_vm15  ;;  %v1857_v42 = vstv %s546_s21  ;;  %v2612_v43 = vmov 0  ;;  %v564_v18 = vld [vmem:[%s1860_s22 + $0x40] sm:$0xff]  ;;  %v565_v20 = vld [vmem:[%s1860_s22 + $0x48] sm:$0xff]  ;;  %s1952_s21 = sld [smem:[#allocation6 + %s1580_s12]]  ;;  %p2011_p5 = por %p634_p2, %p368_p11 }
  0x84   : > { %v518_v40 = vrot.slane %v517_v34, 4  ;;  %vm1865_vm8 = vmand %vm1834_vm14, %vm377_vm0  ;;  %v534_v44 = vsel %vm1853_vm10, %v1741_v6, -inf  ;;  %vm569_vm13 = vcmp.le.s32.totalorder %v1840_v37, 0  ;;  %vm570_vm15 = vcmp.le.s32.totalorder %v1840_v37, 1  ;;  %v1907_v6 = vld [vmem:[%s1860_s22 + $0x28] sm:$0xff]  ;;  %p938_p3 = scmp.le.s32.totalorder %s1881_s27, %s1878_s26  ;;  %v566_v28 = vld [vmem:[%s1860_s22 + $0x50] sm:$0xff]  ;;  %p2021_p6 = por %p634_p2, %p380_p1 }
  0x85   : > { %v476_v1 = vmax.f32 %v474_v30, %v475_v38  ;;  %v498_v4 = vmax.f32 %v496_v31, %v497_v39  ;;  %v2613_v43 = vsel %vm1865_vm8, 4294967295, %v2612_v43  ;;  %v535_v46 = vsel %vm1865_vm8, %v464_v14, -inf  ;;  %v1922_v14 = vld [vmem:[%s1860_s22 + $0x38] sm:$0xff]  ;;  %s647_s2 = scalar_select %p1975_p10, 1, 0 }
  0x86   : > { %v519_v45 = vmax.f32 %v517_v34, %v518_v40  ;;  %v536_v47 = vsel %vm2540_vm1, %v534_v44, -inf  ;;  %v537_v50 = vsel %vm2540_vm1, %v535_v46, -inf  ;;  %v575_v56 = vstv %s1822_s20  ;;  %v567_v29 = vld [vmem:[%s1860_s22 + $0x58] sm:$0xff]  ;;  %p2049_p9 = por %p938_p3, %p344_p4  ;;  %p2059_p13 = por %p938_p3, %p356_p7 }
  0x87   : > { %v477_v48 = vrot.slane %v476_v1, 2  ;;  %v499_v49 = vrot.slane %v498_v4, 2  ;;  %v538_v52 = vmax.f32 %v536_v47, %v537_v50  ;;  %vm576_vm12 = vcmp.gt.s32.totalorder %v575_v56, 0  ;;  %p2079_p0 = por %p938_p3, %p368_p11  ;;  %p2089_p12 = por %p938_p3, %p380_p1 }
  0x88   : > { %v520_v51 = vrot.slane %v519_v45, 2  ;;  %vm577_vm6 = vcmp.gt.s32.totalorder %v575_v56, 1  ;;  %vm578_vm4 = vcmp.gt.s32.totalorder %v575_v56, 2  ;;  %vm1911_vm14 = vmand %vm569_vm13, %vm576_vm12  ;;  %vm580_vm1 = vcmp.gt.s32.totalorder %v575_v56, 4  ;;  %s664_s3 = scalar_select %p1985_p8, 1, 0 }
  0x89   : > { %v478_v53 = vmax.f32 %v476_v1, %v477_v48  ;;  %v500_v54 = vmax.f32 %v498_v4, %v499_v49  ;;  %v539_v58 = vrot.slane %v538_v52, 4  ;;  %vm581_vm0 = vcmp.gt.s32.totalorder %v575_v56, 5  ;;  %vm1927_vm12 = vmand %vm570_vm15, %vm577_vm6  ;;  %s681_s25 = scalar_select %p2011_p5, 1, 0 }
  0x8a   : > { %v521_v57 = vmax.f32 %v519_v45, %v520_v51  ;;  %vm2618_vm6 = vcmp.le.s32.totalorder %v1840_v37, 2  ;;  %v600_v22 = vsel %vm1911_vm14, %v1889_v55, -inf  ;;  %v601_v24 = vsel %vm1911_vm14, %v1894_v59, -inf  ;;  %s698_s22 = scalar_select %p2021_p6, 1, 0 }
  0x8b   : > { %v479_v63 = vrot.slane %v478_v53, 1  ;;  %v501_v0 = vrot.slane %v500_v54, 1  ;;  %v540_v12 = vmax.f32 %v538_v52, %v539_v58  ;;  %vm1941_vm13 = vmand %vm2618_vm6, %vm578_vm4  ;;  %vm2621_vm4 = vcmp.gt.s32.totalorder %v575_v56, 3  ;;  %s2118_s8 = sld [smem:[#allocation8 + %s1580_s12]] }
  0x8c   : > { %v522_v9 = vrot.slane %v521_v57, 1  ;;  %vm2622_vm15 = vcmp.le.s32.totalorder %v1840_v37, 3  ;;  %v602_v31 = vsel %vm1927_vm12, %v1897_v61, -inf  ;;  %v603_v32 = vsel %vm1927_vm12, %v1900_v62, -inf  ;;  %s951_s19 = scalar_select %p2049_p9, 1, 0 }
  0x8d   : > { %v480_v16 = vmax.f32 %v478_v53, %v479_v63  ;;  %v502_v17 = vmax.f32 %v500_v54, %v501_v0  ;;  %v541_v27 = vrot.slane %v540_v12, 2  ;;  %vm1959_vm14 = vmand %vm2622_vm15, %vm2621_vm4  ;;  %vm2627_vm6 = vcmp.eq.s32.totalorder %v1746_v8, 1  ;;  %s968_s24 = scalar_select %p2059_p13, 1, 0 }
  0x8e   : > { %v523_v26 = vmax.f32 %v521_v57, %v522_v9  ;;  %vm2628_vm12 = vcmp.eq.s32.totalorder %v1758_v11, 1  ;;  %vm2629_vm4 = vcmp.le.s32.totalorder %v1840_v37, 4  ;;  %v604_v36 = vsel %vm1941_vm13, %v560_v2, -inf }
  0x8f   : > { %v485_v33 = vsel %vm2627_vm6, 0.0, %v480_v16  ;;  %v507_v34 = vsel %vm2628_vm12, 0.0, %v502_v17  ;;  %vm1996_vm15 = vmand %vm2629_vm4, %vm580_vm1  ;;  %v605_v8 = vsel %vm1941_vm13, %v1907_v6, -inf  ;;  %vm2634_vm1 = vcmask 24576  }
  0x90   : > { %487 = vst.msk [vmem:[%s1918_s11] sm:$0x1] %vm2634_vm1, %v485_v33  ;;  %vm2635_vm13 = vmmov %vm2634_vm1  ;;  %vm2636_vm6 = vcmp.eq.s32.totalorder %v1803_v25, 1  ;;  %v542_v38 = vmax.f32 %v540_v12, %v541_v27  ;;  %vm2637_vm12 = vcmp.le.s32.totalorder %v1840_v37, 5  ;;  %v606_v40 = vsel %vm1959_vm14, %v562_v13, -inf }
  0x91   : > { %508 = vst.msk [vmem:[%s1918_s11 + $0x1] sm:$0x1] %vm2635_vm13, %v507_v34  ;;  %v528_v11 = vsel %vm2636_vm6, 0.0, %v523_v26  ;;  %vm2034_vm4 = vmand %vm2637_vm12, %vm581_vm0  ;;  %v607_v1 = vsel %vm1959_vm14, %v1922_v14, -inf  ;;  %v608_v25 = vsel %vm1996_vm15, %v564_v18, -inf  ;;  %v609_v37 = vsel %vm1996_vm15, %v565_v20, -inf  ;;  %p786_p2 = scmp.le.s32.totalorder %s2118_s8, %s1952_s21 }
  0x92   : > { %vm2642_vm0 = vmmov %vm2634_vm1  ;;  %v610_v4 = vsel %vm2034_vm4, %v566_v28, -inf  ;;  %v611_v44 = vsel %vm2034_vm4, %v567_v29, -inf  ;;  %v543_v45 = vrot.slane %v542_v38, 1  ;;  %vm2645_vm14 = vcmask 31744  }
  0x93   : > { %529 = vst.msk [vmem:[%s1918_s11 + $0x2] sm:$0x1] %vm2642_vm0, %v528_v11  ;;  %v612_v46 = vsel %vm2645_vm14, %v600_v22, -inf  ;;  %vm2646_vm15 = vmmov %vm2645_vm14  ;;  %v2120_v13 = vstv %s647_s2  ;;  %v2122_v14 = vstv %s664_s3  ;;  %v2124_v15 = vstv %s681_s25  ;;  %s1142_s2 = sshll.u32 %s1934_s16, 4  ;;  %p2253_p3 = por %p786_p2, %p344_p4 }
  0x94   : > { %v613_v47 = vsel %vm2646_vm15, %v602_v31, -inf  ;;  %vm2647_vm1 = vmmov %vm2645_vm14  ;;  %v544_v53 = vmax.f32 %v542_v38, %v543_v45  ;;  %v2129_v16 = vstv %s1952_s21  ;;  %s2157_s3 = scalar_lea.vmem %s1499_s28, %s1142_s2  ;;  %p2269_p10 = por %p786_p2, %p356_p7 }
  0x95   : > { %v614_v48 = vsel %vm2647_vm1, %v604_v36, -inf  ;;  %vm2648_vm13 = vmmov %vm2647_vm1  ;;  %p2281_p4 = por %p786_p2, %p368_p11  ;;  %p2295_p7 = por %p786_p2, %p380_p1 }
  0x96   : > { %v615_v49 = vmax.f32 %v612_v46, %v614_v48  ;;  %v616_v50 = vsel %vm2648_vm13, %v606_v40, -inf  ;;  %vm2649_vm6 = vmmov %vm2647_vm1  ;;  %vm2656_vm13 = vcmp.eq.s32.totalorder %v1857_v42, 1  ;;  %v2126_v42 = vstv %s698_s22  ;;  %v2172_v48 = vld [vmem:[%s2157_s3 + $0x8] sm:$0xff]  ;;  %s799_s0 = scalar_select %p2253_p3, 1, 0 }
  0x97   : > { %v618_v51 = vsel %vm2649_vm6, %v608_v25, -inf  ;;  %vm2650_vm12 = vmmov %vm2647_vm1  ;;  %v617_v54 = vmax.f32 %v613_v47, %v616_v50  ;;  %v549_v62 = vsel %vm2656_vm13, 0.0, %v544_v53  ;;  %vm2657_vm6 = vcmask 24576   ;;  %v708_v47 = vld [vmem:[%s2157_s3] sm:$0xff]  ;;  %v710_v50 = vld [vmem:[%s2157_s3 + $0x10] sm:$0xff] }
  0x98   : > { %v620_v52 = vsel %vm2650_vm12, %v610_v4, -inf  ;;  %vm2651_vm4 = vmmov %vm2647_vm1  ;;  %v619_v57 = vmax.f32 %v615_v49, %v618_v51  ;;  %550 = vst.msk [vmem:[%s1918_s11 + $0x3] sm:$0x1] %vm2657_vm6, %v549_v62  ;;  %v727_v40 = vstv %s2118_s8  ;;  %v2176_v51 = vld [vmem:[%s2157_s3 + $0x18] sm:$0xff]  ;;  %s816_s12 = scalar_select %p2269_p10, 1, 0 }
  0x99   : > { %v623_v55 = vsel %vm2651_vm4, %v601_v24, -inf  ;;  %vm2652_vm0 = vmmov %vm2647_vm1  ;;  %v621_v63 = vmax.f32 %v617_v54, %v620_v52  ;;  %v715_v62 = vld [vmem:[%s2157_s3 + $0x38] sm:$0xff]  ;;  %s833_s13 = scalar_select %p2281_p4, 1, 0 }
  0x9a   : > { %v624_v56 = vsel %vm2652_vm0, %v603_v32, -inf  ;;  %vm2653_vm14 = vmmov %vm2652_vm0  ;;  %s850_s14 = scalar_select %p2295_p7, 1, 0 }
  0x9b   : > { %v625_v58 = vsel %vm2653_vm14, %v605_v8, -inf  ;;  %vm2654_vm15 = vmmov %vm2652_vm0  ;;  %v622_v7 = vmax.f32 %v619_v57, %v621_v63  ;;  %v2186_v57 = vld [vmem:[%s2157_s3 + $0x28] sm:$0xff] }
  0x9c   : > { %v627_v59 = vsel %vm2654_vm15, %v607_v1, -inf  ;;  %vm2655_vm1 = vmmov %vm2652_vm0  ;;  %v626_v0 = vmax.f32 %v623_v55, %v625_v58 }
  0x9d   : > { %v629_v61 = vsel %vm2655_vm1, %v609_v37, -inf  ;;  %v628_v2 = vmax.f32 %v624_v56, %v627_v59  ;;  %vm2658_vm12 = vmmov %vm2652_vm0  ;;  %v635_v18 = vsel %vm1702_vm3, %v622_v7, -inf  ;;  %v652_v20 = vsel %vm1716_vm2, %v622_v7, -inf  ;;  %v712_v56 = vld [vmem:[%s2157_s3 + $0x20] sm:$0xff] }
  0x9e   : > { %v631_v6 = vsel %vm2658_vm12, %v611_v44, -inf  ;;  %v630_v9 = vmax.f32 %v626_v0, %v629_v61  ;;  %v669_v21 = vsel %vm1782_vm7, %v622_v7, -inf  ;;  %vm2659_vm4 = vmmov %vm2652_vm0  ;;  %v654_v24 = vsel %vm2652_vm0, %v652_v20, -inf  ;;  %v714_v61 = vld [vmem:[%s2157_s3 + $0x30] sm:$0xff] }
  0x9f   : > { %v632_v12 = vmax.f32 %v628_v2, %v631_v6  ;;  %v637_v22 = vsel %vm2659_vm4, %v635_v18, -inf  ;;  %vm2660_vm14 = vmmov %vm2652_vm0  ;;  %v686_v27 = vsel %vm1853_vm10, %v622_v7, -inf  ;;  %vm721_vm4 = vcmp.le.s32.totalorder %v2129_v16, 0 }
  0xa0   : > { %v671_v26 = vsel %vm2660_vm14, %v669_v21, -inf  ;;  %vm2661_vm15 = vmmov %vm2652_vm0  ;;  %vm732_vm14 = vcmp.gt.s32.totalorder %v727_v40, 4 }
  0xa1   : > { %v633_v17 = vmax.f32 %v630_v9, %v632_v12  ;;  %vm2662_vm1 = vmmov %vm2652_vm0  ;;  %v716_v12 = vld [vmem:[%s2157_s3 + $0x40] sm:$0xff] }
  0xa2   : > { %vm2663_vm13 = vmmov %vm2652_vm0 }
  0xa3   : > { %v636_v28 = vsel %vm1737_vm11, %v633_v17, -inf  ;;  %v653_v29 = vsel %vm1751_vm5, %v633_v17, -inf  ;;  %v670_v30 = vsel %vm1796_vm9, %v633_v17, -inf  ;;  %v687_v31 = vsel %vm1865_vm8, %v633_v17, -inf  ;;  %vm2664_vm6 = vmmov %vm2652_vm0  ;;  %v717_v17 = vld [vmem:[%s2157_s3 + $0x48] sm:$0xff] }
  0xa4   : > { %v638_v32 = vsel %vm2661_vm15, %v636_v28, -inf  ;;  %v655_v33 = vsel %vm2662_vm1, %v653_v29, -inf  ;;  %v672_v34 = vsel %vm2663_vm13, %v670_v30, -inf  ;;  %v688_v35 = vsel %vm2664_vm6, %v686_v27, -inf  ;;  %vm2665_vm12 = vmmov %vm2652_vm0 }
  0xa5   : > { %v639_v36 = vmax.f32 %v637_v22, %v638_v32  ;;  %v656_v8 = vmax.f32 %v654_v24, %v655_v33  ;;  %v673_v11 = vmax.f32 %v671_v26, %v672_v34  ;;  %v689_v38 = vsel %vm2665_vm12, %v687_v31, -inf  ;;  %v718_v22 = vld [vmem:[%s2157_s3 + $0x50] sm:$0xff]  ;;  %v719_v32 = vld [vmem:[%s2157_s3 + $0x58] sm:$0xff] }
  0xa6   : > { %v690_v39 = vmax.f32 %v688_v35, %v689_v38  ;;  %vm728_vm13 = vcmp.gt.s32.totalorder %v727_v40, 0  ;;  %vm729_vm1 = vcmp.gt.s32.totalorder %v727_v40, 1  ;;  %vm730_vm15 = vcmp.gt.s32.totalorder %v727_v40, 2 }
  0xa7   : > { %v640_v1 = vrot.slane %v639_v36, 4  ;;  %v657_v25 = vrot.slane %v656_v8, 4  ;;  %v674_v37 = vrot.slane %v673_v11, 4  ;;  %vm2180_vm12 = vmand %vm721_vm4, %vm728_vm13  ;;  %vm2668_vm6 = vcmp.le.s32.totalorder %v2129_v16, 1 }
  0xa8   : > { %v691_v4 = vrot.slane %v690_v39, 4  ;;  %vm2190_vm8 = vmand %vm2668_vm6, %vm729_vm1  ;;  %vm733_vm4 = vcmp.gt.s32.totalorder %v727_v40, 5  ;;  %vm2671_vm13 = vcmp.le.s32.totalorder %v2129_v16, 2  ;;  %v752_v0 = vsel %vm2180_vm12, %v708_v47, -inf }
  0xa9   : > { %v641_v44 = vmax.f32 %v639_v36, %v640_v1  ;;  %v658_v45 = vmax.f32 %v656_v8, %v657_v25  ;;  %v675_v46 = vmax.f32 %v673_v11, %v674_v37  ;;  %vm2201_vm0 = vmand %vm2671_vm13, %vm730_vm15  ;;  %v753_v2 = vsel %vm2180_vm12, %v2172_v48, -inf }
  0xaa   : > { %v692_v49 = vmax.f32 %v690_v39, %v691_v4  ;;  %vm2674_vm15 = vcmp.gt.s32.totalorder %v727_v40, 3  ;;  %vm2675_vm1 = vcmp.le.s32.totalorder %v2129_v16, 3  ;;  %v754_v20 = vsel %vm2190_vm8, %v710_v50, -inf }
  0xab   : > { %v642_v53 = vrot.slane %v641_v44, 2  ;;  %v659_v54 = vrot.slane %v658_v45, 2  ;;  %v676_v55 = vrot.slane %v675_v46, 2  ;;  %vm2215_vm6 = vmand %vm2675_vm1, %vm2674_vm15  ;;  %vm2678_vm12 = vcmp.le.s32.totalorder %v2129_v16, 4 }
  0xac   : > { %v693_v59 = vrot.slane %v692_v49, 2  ;;  %vm2225_vm13 = vmand %vm2678_vm12, %vm732_vm14  ;;  %v755_v26 = vsel %vm2190_vm8, %v2176_v51, -inf  ;;  %v756_v27 = vsel %vm2201_vm0, %v712_v56, -inf  ;;  %v757_v28 = vsel %vm2201_vm0, %v2186_v57, -inf }
  0xad   : > { %v643_v6 = vmax.f32 %v641_v44, %v642_v53  ;;  %v660_v7 = vmax.f32 %v658_v45, %v659_v54  ;;  %v677_v9 = vmax.f32 %v675_v46, %v676_v55  ;;  %vm2681_vm14 = vcmp.le.s32.totalorder %v2129_v16, 5 }
  0xae   : > { %v694_v21 = vmax.f32 %v692_v49, %v693_v59  ;;  %vm2241_vm15 = vmand %vm2681_vm14, %vm733_vm4  ;;  %v758_v34 = vsel %vm2215_vm6, %v714_v61, -inf  ;;  %v759_v16 = vsel %vm2215_vm6, %v715_v62, -inf  ;;  %v760_v36 = vsel %vm2225_vm13, %v716_v12, -inf }
  0xaf   : > { %v644_v29 = vrot.slane %v643_v6, 1  ;;  %v661_v30 = vrot.slane %v660_v7, 1  ;;  %v678_v31 = vrot.slane %v677_v9, 1  ;;  %v761_v8 = vsel %vm2225_vm13, %v717_v17, -inf }
  0xb0   : > { %v695_v35 = vrot.slane %v694_v21, 1  ;;  %v762_v40 = vsel %vm2241_vm15, %v718_v22, -inf  ;;  %v763_v25 = vsel %vm2241_vm15, %v719_v32, -inf  ;;  %vm2687_vm8 = vcmask 31744  }
  0xb1   : > { %v645_v11 = vmax.f32 %v643_v6, %v644_v29  ;;  %v662_v38 = vmax.f32 %v660_v7, %v661_v30  ;;  %v679_v39 = vmax.f32 %v677_v9, %v678_v31  ;;  %v764_v37 = vsel %vm2687_vm8, %v752_v0, -inf  ;;  %vm2688_vm0 = vmmov %vm2687_vm8 }
  0xb2   : > { %v696_v1 = vmax.f32 %v694_v21, %v695_v35  ;;  %v765_v4 = vsel %vm2688_vm0, %v754_v20, -inf  ;;  %vm2690_vm4 = vcmp.eq.s32.totalorder %v2120_v13, 1  ;;  %vm2691_vm1 = vcmp.eq.s32.totalorder %v2122_v14, 1  ;;  %vm2693_vm12 = vmmov %vm2688_vm0 }
  0xb3   : > { %v650_v44 = vsel %vm2690_vm4, 0.0, %v645_v11  ;;  %v667_v45 = vsel %vm2691_vm1, 0.0, %v662_v38  ;;  %vm2692_vm6 = vcmp.eq.s32.totalorder %v2124_v15, 1  ;;  %v766_v47 = vsel %vm2693_vm12, %v756_v27, -inf  ;;  %vm2698_vm4 = vmmov %vm2688_vm0 }
  0xb4   : > { %v684_v46 = vsel %vm2692_vm6, 0.0, %v679_v39  ;;  %vm2694_vm13 = vcmask 24576   ;;  %vm2697_vm8 = vcmp.eq.s32.totalorder %v2126_v42, 1  ;;  %v767_v14 = vmax.f32 %v764_v37, %v766_v47  ;;  %vm2700_vm6 = vmmov %vm2688_vm0 }
  0xb5   : > { %651 = vst.msk [vmem:[%s1918_s11 + $0x4] sm:$0x1] %vm2694_vm13, %v650_v44  ;;  %vm2695_vm14 = vmmov %vm2694_vm13  ;;  %v701_v13 = vsel %vm2697_vm8, 0.0, %v696_v1  ;;  %v768_v48 = vsel %vm2688_vm0, %v758_v34, -inf  ;;  %v770_v15 = vsel %vm2698_vm4, %v760_v36, -inf  ;;  %v772_v50 = vsel %vm2700_vm6, %v762_v40, -inf }
  0xb6   : > { %668 = vst.msk [vmem:[%s1918_s11 + $0x5] sm:$0x1] %vm2695_vm14, %v667_v45  ;;  %vm2696_vm15 = vmmov %vm2694_vm13  ;;  %v769_v49 = vmax.f32 %v765_v4, %v768_v48  ;;  %v771_v42 = vmax.f32 %v767_v14, %v770_v15  ;;  %v783_v59 = vsel %vm2688_vm0, %v763_v25, -inf  ;;  %v2333_v0 = vstv %s799_s0  ;;  %v860_v45 = vld [vmem:[%s1788_s15] sm:$0xff]  ;;  %v2385_v14 = vld [vmem:[%s1788_s15 + $0x18] sm:$0xff] }
  0xb7   : > { %685 = vst.msk [vmem:[%s1918_s11 + $0x6] sm:$0x1] %vm2696_vm15, %v684_v46  ;;  %vm2699_vm1 = vmmov %vm2694_vm13  ;;  %v2337_v6 = vstv %s833_s13  ;;  %v2339_v7 = vstv %s850_s14  ;;  %v2342_v9 = vstv %s1878_s26  ;;  %s1002_s26 = scalar_select %p2089_p12, 1, 0 }
  0xb8   : > { %702 = vst.msk [vmem:[%s1918_s11 + $0x7] sm:$0x1] %vm2699_vm1, %v701_v13  ;;  %vm2701_vm12 = vmmov %vm2688_vm0  ;;  %v773_v56 = vmax.f32 %v769_v49, %v772_v50  ;;  %v879_v25 = vstv %s1881_s27  ;;  %v2381_v46 = vld [vmem:[%s1788_s15 + $0x8] sm:$0xff]  ;;  %v862_v13 = vld [vmem:[%s1788_s15 + $0x10] sm:$0xff] }
  0xb9   : > { %v775_v51 = vsel %vm2701_vm12, %v753_v2, -inf  ;;  %vm2702_vm13 = vmmov %vm2688_vm0  ;;  %v2335_v2 = vstv %s816_s12  ;;  %vm2709_vm12 = vnez %v2613_v43 }
  0xba   : > { %v776_v52 = vsel %vm2702_vm13, %v755_v26, -inf  ;;  %vm2703_vm14 = vmmov %vm2688_vm0  ;;  %v774_v61 = vmax.f32 %v771_v42, %v773_v56 }
  0xbb   : > { %v777_v53 = vsel %vm2703_vm14, %v757_v28, -inf  ;;  %vm2704_vm15 = vmmov %vm2688_vm0 }
  0xbc   : > { %v779_v54 = vsel %vm2704_vm15, %v759_v16, -inf  ;;  %vm2705_vm8 = vmmov %vm2688_vm0  ;;  %v778_v57 = vmax.f32 %v775_v51, %v777_v53  ;;  %v787_v17 = vsel %vm1702_vm3, %v774_v61, -inf  ;;  %v804_v18 = vsel %vm1716_vm2, %v774_v61, -inf  ;;  %v864_v51 = vld [vmem:[%s1788_s15 + $0x20] sm:$0xff] }
  0xbd   : > { %v781_v55 = vsel %vm2705_vm8, %v761_v8, -inf  ;;  %v780_v58 = vmax.f32 %v776_v52, %v779_v54  ;;  %v821_v20 = vsel %vm1782_vm7, %v774_v61, -inf  ;;  %vm2706_vm4 = vmmov %vm2688_vm0  ;;  %v838_v26 = vsel %vm1853_vm10, %v774_v61, -inf  ;;  %v865_v52 = vld [vmem:[%s1788_s15 + $0x28] sm:$0xff]  ;;  %v866_v54 = vld [vmem:[%s1788_s15 + $0x30] sm:$0xff] }
  0xbe   : > { %v782_v62 = vmax.f32 %v778_v57, %v781_v55  ;;  %v789_v21 = vsel %vm2706_vm4, %v787_v17, -inf  ;;  %vm2707_vm1 = vmmov %vm2688_vm0  ;;  %vm873_vm4 = vcmp.le.s32.totalorder %v2342_v9, 0  ;;  %v867_v55 = vld [vmem:[%s1788_s15 + $0x38] sm:$0xff] }
  0xbf   : > { %v784_v63 = vmax.f32 %v780_v58, %v783_v59  ;;  %v806_v22 = vsel %vm2707_vm1, %v804_v18, -inf  ;;  %vm2708_vm6 = vmmov %vm2688_vm0  ;;  %vm874_vm1 = vcmp.le.s32.totalorder %v2342_v9, 1 }
  0xc0   : > { %v823_v24 = vsel %vm2708_vm6, %v821_v20, -inf  ;;  %vm2710_vm13 = vmmov %vm2688_vm0 }
  0xc1   : > { %v785_v12 = vmax.f32 %v782_v62, %v784_v63  ;;  %vm2711_vm14 = vmmov %vm2688_vm0  ;;  %v868_v63 = vld [vmem:[%s1788_s15 + $0x40] sm:$0xff] }
  0xc2   : > { %vm2712_vm15 = vmmov %vm2688_vm0 }
  0xc3   : > { %v788_v27 = vsel %vm1737_vm11, %v785_v12, -inf  ;;  %v805_v28 = vsel %vm1751_vm5, %v785_v12, -inf  ;;  %v822_v29 = vsel %vm1796_vm9, %v785_v12, -inf  ;;  %v839_v30 = vsel %vm2709_vm12, %v785_v12, -inf  ;;  %vm2713_vm8 = vmmov %vm2688_vm0  ;;  %v869_v12 = vld [vmem:[%s1788_s15 + $0x48] sm:$0xff] }
  0xc4   : > { %v790_v31 = vsel %vm2710_vm13, %v788_v27, -inf  ;;  %v807_v32 = vsel %vm2711_vm14, %v805_v28, -inf  ;;  %v824_v33 = vsel %vm2712_vm15, %v822_v29, -inf  ;;  %v840_v34 = vsel %vm2713_vm8, %v838_v26, -inf }
  0xc5   : > { %v791_v35 = vmax.f32 %v789_v21, %v790_v31  ;;  %v808_v16 = vmax.f32 %v806_v22, %v807_v32  ;;  %v825_v36 = vmax.f32 %v823_v24, %v824_v33  ;;  %v841_v8 = vsel %vm2688_vm0, %v839_v30, -inf  ;;  %v870_v21 = vld [vmem:[%s1788_s15 + $0x50] sm:$0xff]  ;;  %v871_v31 = vld [vmem:[%s1788_s15 + $0x58] sm:$0xff]  ;;  %s985_s15 = scalar_select %p2079_p0, 1, 0 }
  0xc6   : > { %v842_v11 = vmax.f32 %v840_v34, %v841_v8  ;;  %vm880_vm14 = vcmp.gt.s32.totalorder %v879_v25, 0  ;;  %vm881_vm8 = vcmp.gt.s32.totalorder %v879_v25, 1  ;;  %vm882_vm15 = vcmp.gt.s32.totalorder %v879_v25, 2 }
  0xc7   : > { %v792_v38 = vrot.slane %v791_v35, 4  ;;  %v809_v39 = vrot.slane %v808_v16, 4  ;;  %v826_v40 = vrot.slane %v825_v36, 4  ;;  %vm2389_vm0 = vmand %vm873_vm4, %vm880_vm14  ;;  %vm884_vm13 = vcmp.gt.s32.totalorder %v879_v25, 4 }
  0xc8   : > { %v843_v1 = vrot.slane %v842_v11, 4  ;;  %vm2397_vm12 = vmand %vm874_vm1, %vm881_vm8  ;;  %vm885_vm4 = vcmp.gt.s32.totalorder %v879_v25, 5  ;;  %vm2718_vm14 = vcmp.le.s32.totalorder %v2342_v9, 2  ;;  %v904_v57 = vsel %vm2389_vm0, %v860_v45, -inf }
  0xc9   : > { %v793_v37 = vmax.f32 %v791_v35, %v792_v38  ;;  %v810_v4 = vmax.f32 %v808_v16, %v809_v39  ;;  %v827_v44 = vmax.f32 %v825_v36, %v826_v40  ;;  %vm2405_vm6 = vmand %vm2718_vm14, %vm882_vm15  ;;  %v905_v58 = vsel %vm2389_vm0, %v2381_v46, -inf }
  0xca   : > { %v844_v47 = vmax.f32 %v842_v11, %v843_v1  ;;  %vm2721_vm1 = vcmp.gt.s32.totalorder %v879_v25, 3  ;;  %vm2722_vm8 = vcmp.le.s32.totalorder %v2342_v9, 3  ;;  %v906_v18 = vsel %vm2397_vm12, %v862_v13, -inf }
  0xcb   : > { %v794_v15 = vrot.slane %v793_v37, 2  ;;  %v811_v49 = vrot.slane %v810_v4, 2  ;;  %v828_v50 = vrot.slane %v827_v44, 2  ;;  %vm2419_vm15 = vmand %vm2722_vm8, %vm2721_vm1  ;;  %vm2725_vm0 = vcmp.le.s32.totalorder %v2342_v9, 4 }
  0xcc   : > { %v845_v53 = vrot.slane %v844_v47, 2  ;;  %vm2429_vm14 = vmand %vm2725_vm0, %vm884_vm13  ;;  %v907_v24 = vsel %vm2397_vm12, %v2385_v14, -inf  ;;  %v908_v26 = vsel %vm2405_vm6, %v864_v51, -inf  ;;  %v909_v27 = vsel %vm2405_vm6, %v865_v52, -inf }
  0xcd   : > { %v795_v59 = vmax.f32 %v793_v37, %v794_v15  ;;  %v812_v61 = vmax.f32 %v810_v4, %v811_v49  ;;  %v829_v62 = vmax.f32 %v827_v44, %v828_v50  ;;  %vm2728_vm13 = vcmp.le.s32.totalorder %v2342_v9, 5 }
  0xce   : > { %v846_v20 = vmax.f32 %v844_v47, %v845_v53  ;;  %vm2444_vm1 = vmand %vm2728_vm13, %vm885_vm4  ;;  %v910_v33 = vsel %vm2419_vm15, %v866_v54, -inf  ;;  %v911_v35 = vsel %vm2419_vm15, %v867_v55, -inf  ;;  %v912_v16 = vsel %vm2429_vm14, %v868_v63, -inf }
  0xcf   : > { %v796_v28 = vrot.slane %v795_v59, 1  ;;  %v813_v29 = vrot.slane %v812_v61, 1  ;;  %v830_v30 = vrot.slane %v829_v62, 1  ;;  %v913_v9 = vsel %vm2429_vm14, %v869_v12, -inf }
  0xd0   : > { %v847_v34 = vrot.slane %v846_v20, 1  ;;  %v914_v38 = vsel %vm2444_vm1, %v870_v21, -inf  ;;  %v915_v40 = vsel %vm2444_vm1, %v871_v31, -inf  ;;  %vm2731_vm12 = vcmask 31744  }
  0xd1   : > { %v797_v36 = vmax.f32 %v795_v59, %v796_v28  ;;  %v814_v8 = vmax.f32 %v812_v61, %v813_v29  ;;  %v831_v11 = vmax.f32 %v829_v62, %v830_v30  ;;  %v916_v1 = vsel %vm2731_vm12, %v904_v57, -inf  ;;  %vm2732_vm6 = vmmov %vm2731_vm12 }
  0xd2   : > { %v848_v39 = vmax.f32 %v846_v20, %v847_v34  ;;  %v917_v25 = vsel %vm2732_vm6, %v906_v18, -inf  ;;  %vm2733_vm4 = vcmp.eq.s32.totalorder %v2333_v0, 1  ;;  %vm2734_vm8 = vcmp.eq.s32.totalorder %v2335_v2, 1  ;;  %vm2736_vm0 = vmmov %vm2732_vm6 }
  0xd3   : > { %v802_v37 = vsel %vm2733_vm4, 0.0, %v797_v36  ;;  %v819_v4 = vsel %vm2734_vm8, 0.0, %v814_v8  ;;  %vm2735_vm15 = vcmp.eq.s32.totalorder %v2337_v6, 1  ;;  %v918_v45 = vsel %vm2736_vm0, %v908_v26, -inf  ;;  %vm2741_vm6 = vmmov %vm2736_vm0 }
  0xd4   : > { %v836_v44 = vsel %vm2735_vm15, 0.0, %v831_v11  ;;  %vm2737_vm14 = vcmask 24576   ;;  %vm2740_vm12 = vcmp.eq.s32.totalorder %v2339_v7, 1  ;;  %v919_v47 = vmax.f32 %v916_v1, %v918_v45  ;;  %vm2742_vm4 = vmmov %vm2736_vm0 }
  0xd5   : > { %803 = vst.msk [vmem:[%s1918_s11 + $0x8] sm:$0x1] %vm2737_vm14, %v802_v37  ;;  %vm2738_vm13 = vmmov %vm2737_vm14  ;;  %v853_v46 = vsel %vm2740_vm12, 0.0, %v848_v39  ;;  %v920_v0 = vsel %vm2741_vm6, %v910_v33, -inf  ;;  %v922_v2 = vsel %vm2742_vm4, %v912_v16, -inf  ;;  %v927_v14 = vsel %vm2736_vm0, %v905_v58, -inf }
  0xd6   : > { %820 = vst.msk [vmem:[%s1918_s11 + $0x9] sm:$0x1] %vm2738_vm13, %v819_v4  ;;  %vm2739_vm1 = vmmov %vm2738_vm13  ;;  %v921_v6 = vmax.f32 %v917_v25, %v920_v0  ;;  %v923_v15 = vmax.f32 %v919_v47, %v922_v2  ;;  %v969_v36 = vstv %s968_s24  ;;  %v1003_v25 = vstv %s1002_s26 }
  0xd7   : > { %837 = vst.msk [vmem:[%s1918_s11 + $0xa] sm:$0x1] %vm2739_vm1, %v836_v44  ;;  %vm2743_vm8 = vmmov %vm2739_vm1 }
  0xd8   : > { %854 = vst.msk [vmem:[%s1918_s11 + $0xb] sm:$0x1] %vm2743_vm8, %v853_v46  ;;  %vm2744_vm15 = vmmov %vm2736_vm0 }
  0xd9   : > { %v924_v13 = vsel %vm2744_vm15, %v914_v38, -inf  ;;  %vm2745_vm14 = vmmov %vm2736_vm0 }
  0xda   : > { %v928_v48 = vsel %vm2745_vm14, %v907_v24, -inf  ;;  %vm2746_vm13 = vmmov %vm2736_vm0  ;;  %v925_v51 = vmax.f32 %v921_v6, %v924_v13 }
  0xdb   : > { %v929_v49 = vsel %vm2746_vm13, %v909_v27, -inf  ;;  %vm2747_vm1 = vmmov %vm2736_vm0  ;;  %vm1004_vm13 = vcmp.eq.s32.totalorder %v1003_v25, 1 }
  0xdc   : > { %v931_v7 = vsel %vm2747_vm1, %v911_v35, -inf  ;;  %vm2748_vm12 = vmmov %vm2736_vm0  ;;  %v930_v52 = vmax.f32 %v927_v14, %v929_v49  ;;  %v926_v54 = vmax.f32 %v923_v15, %v925_v51  ;;  %vm2758_vm1 = vcmask 24576  }
  0xdd   : > { %v933_v50 = vsel %vm2748_vm12, %v913_v9, -inf  ;;  %v932_v42 = vmax.f32 %v928_v48, %v931_v7  ;;  %vm2749_vm6 = vmmov %vm2736_vm0  ;;  %v952_v9 = vstv %s951_s19 }
  0xde   : > { %v935_v53 = vsel %vm2749_vm6, %v915_v40, -inf  ;;  %v934_v55 = vmax.f32 %v930_v52, %v933_v50  ;;  %v939_v58 = vsel %vm1702_vm3, %v926_v54, -inf  ;;  %v956_v59 = vsel %vm1716_vm2, %v926_v54, -inf  ;;  %vm2750_vm4 = vmmov %vm2736_vm0 }
  0xdf   : > { %v936_v56 = vmax.f32 %v932_v42, %v935_v53  ;;  %v973_v61 = vsel %vm1782_vm7, %v926_v54, -inf  ;;  %v941_v62 = vsel %vm2750_vm4, %v939_v58, -inf  ;;  %vm2751_vm8 = vmmov %vm2736_vm0  ;;  %v990_v17 = vsel %vm1853_vm10, %v926_v54, -inf }
  0xe0   : > { %v958_v63 = vsel %vm2751_vm8, %v956_v59, -inf  ;;  %vm2752_vm15 = vmmov %vm2736_vm0  ;;  %vm2753_vm3 = vnez %v2613_v43  ;;  %v986_v40 = vstv %s985_s15 }
  0xe1   : > { %v937_v57 = vmax.f32 %v934_v55, %v936_v56  ;;  %v975_v12 = vsel %vm2752_vm15, %v973_v61, -inf  ;;  %vm2754_vm2 = vmmov %vm2736_vm0  ;;  %vm987_vm14 = vcmp.eq.s32.totalorder %v986_v40, 1 }
  0xe2   : > { %vm2755_vm7 = vmmov %vm2736_vm0 }
  0xe3   : > { %v940_v60 = vsel %vm1737_vm11, %v937_v57, -inf  ;;  %v957_v3 = vsel %vm1751_vm5, %v937_v57, -inf  ;;  %v974_v19 = vsel %vm1796_vm9, %v937_v57, -inf  ;;  %v991_v18 = vsel %vm2753_vm3, %v937_v57, -inf  ;;  %vm2756_vm10 = vmmov %vm2736_vm0 }
  0xe4   : > { %v942_v20 = vsel %vm2754_vm2, %v940_v60, -inf  ;;  %v959_v21 = vsel %vm2755_vm7, %v957_v3, -inf  ;;  %v976_v41 = vsel %vm2736_vm0, %v974_v19, -inf  ;;  %v992_v5 = vsel %vm2756_vm10, %v990_v17, -inf  ;;  %vm2757_vm11 = vmmov %vm2736_vm0 }
  0xe5   : > { %v943_v22 = vmax.f32 %v941_v62, %v942_v20  ;;  %v960_v10 = vmax.f32 %v958_v63, %v959_v21  ;;  %v977_v24 = vmax.f32 %v975_v12, %v976_v41  ;;  %v993_v23 = vsel %vm2757_vm11, %v991_v18, -inf  ;;  %vm2759_vm12 = vmmov %vm2758_vm1 }
  0xe6   : > { %v994_v26 = vmax.f32 %v992_v5, %v993_v23  ;;  %vm953_vm5 = vcmp.eq.s32.totalorder %v952_v9, 1  ;;  %vm970_vm9 = vcmp.eq.s32.totalorder %v969_v36, 1  ;;  %vm2760_vm6 = vmmov %vm2758_vm1 }
  0xe7   : > { %v944_v27 = vrot.slane %v943_v22, 4  ;;  %v961_v43 = vrot.slane %v960_v10, 4  ;;  %v978_v28 = vrot.slane %v977_v24, 4  ;;  %vm2761_vm4 = vmmov %vm2758_vm1 }
  0xe8   : > { %v995_v29 = vrot.slane %v994_v26, 4 }
  0xe9   : > { %v945_v30 = vmax.f32 %v943_v22, %v944_v27  ;;  %v962_v31 = vmax.f32 %v960_v10, %v961_v43  ;;  %v979_v32 = vmax.f32 %v977_v24, %v978_v28 }
  0xea   : > { %v996_v33 = vmax.f32 %v994_v26, %v995_v29 }
  0xeb   : > { %v946_v34 = vrot.slane %v945_v30, 2  ;;  %v963_v35 = vrot.slane %v962_v31, 2  ;;  %v980_v16 = vrot.slane %v979_v32, 2 }
  0xec   : > { %v997_v8 = vrot.slane %v996_v33, 2 }
  0xed   : > { %v947_v11 = vmax.f32 %v945_v30, %v946_v34  ;;  %v964_v38 = vmax.f32 %v962_v31, %v963_v35  ;;  %v981_v39 = vmax.f32 %v979_v32, %v980_v16 }
  0xee   : > { %v998_v1 = vmax.f32 %v996_v33, %v997_v8 }
  0xef   : > { %v948_v37 = vrot.slane %v947_v11, 1  ;;  %v965_v4 = vrot.slane %v964_v38, 1  ;;  %v982_v44 = vrot.slane %v981_v39, 1 }
  0xf0   : > { %v999_v45 = vrot.slane %v998_v1, 1 }
  0xf1   : > { %v949_v46 = vmax.f32 %v947_v11, %v948_v37  ;;  %v966_v47 = vmax.f32 %v964_v38, %v965_v4  ;;  %v983_v0 = vmax.f32 %v981_v39, %v982_v44 }
  0xf2   : > { %v1000_v2 = vmax.f32 %v998_v1, %v999_v45 }
  0xf3   : > { %v954_v6 = vsel %vm953_vm5, 0.0, %v949_v46  ;;  %v971_v13 = vsel %vm970_vm9, 0.0, %v966_v47  ;;  %v988_v14 = vsel %vm987_vm14, 0.0, %v983_v0 }
  0xf4   : > { %955 = vst.msk [vmem:[%s1918_s11 + $0xc] sm:$0x1] %vm2758_vm1, %v954_v6  ;;  %v1005_v48 = vsel %vm1004_vm13, 0.0, %v1000_v2 }
  0xf5   : > { %972 = vst.msk [vmem:[%s1918_s11 + $0xd] sm:$0x1] %vm2759_vm12, %v971_v13 }
  0xf6   : > { %989 = vst.msk [vmem:[%s1918_s11 + $0xe] sm:$0x1] %vm2760_vm6, %v988_v14 }
  0xf7   : > { %1006 = vst.msk [vmem:[%s1918_s11 + $0xf] sm:$0x1] %vm2761_vm4, %v1005_v48 }
  0xf8 PF: > { %s26_s29 = sadd.s32 1, %s1315_s29  }
  0xf9   : > { %p23_p11 = scmp.ge.s32.totalorder %s26_s29, 10  }
  0xfb   :  { %25 = sbr.rel (!%p23_p11) target bundleno = 19 (0x13), region = 99 }
 0x102   :  { %1028 = vsyncpa [#allocation5], 1 }
 0x103   :  { %1030 = vsyncpa [#allocation5 + $0x1], 1 }
 0x104   :  { %1031 = vsyncpa [#allocation7], 1 }
 0x105   :  { %1032 = vsyncpa [#allocation10], 1 }

</bundles_post_ra>
